<compile_context>
chip_gen: v5e
topology: v5e:2x2
jax: 0.10.0
libtpu: 0.0.40
codegen_flags: <defaults>
</compile_context>

<pallas_src>
import jax
import jax.numpy as jnp
from jax.experimental import pallas as pl
from jax.experimental.pallas import tpu as pltpu

LANE = 128
SUBLANE = 8
TIME_CHUNK = 32  # timesteps per grid step in the recurrent kernel (re-check VMEM budget on v7x)


def _round_up(x, m):
    return (x + m - 1) // m * m


# ----------------------------- Linear kernel ------------------------------ #
def _linear_kernel(x_ref, w_ref, b_ref, o_ref):
    o_ref[...] = (
        jnp.dot(x_ref[...], w_ref[...], preferred_element_type=jnp.float32)
        + b_ref[...]
    )


def linear(x, w, b, tile_rows=512):
    """x: (N, Din), w: (Din, Dout), b: (1, Dout) -> (N, Dout). Row-tiled."""
    N, Din = x.shape
    Dout = w.shape[1]
    tn = min(tile_rows, _round_up(N, SUBLANE))
    Np = _round_up(N, tn)
    if Np != N:
        x = jnp.pad(x, ((0, Np - N), (0, 0)))
    out = pl.pallas_call(
        _linear_kernel,
        grid=(Np // tn,),
        in_specs=[
            pl.BlockSpec((tn, Din), lambda i: (i, 0)),
            pl.BlockSpec((Din, Dout), lambda i: (0, 0)),
            pl.BlockSpec((1, Dout), lambda i: (0, 0)),
        ],
        out_specs=pl.BlockSpec((tn, Dout), lambda i: (i, 0)),
        out_shape=jax.ShapeDtypeStruct((Np, Dout), jnp.float32),
        compiler_params=pltpu.CompilerParams(dimension_semantics=("parallel",)),
    )(x, w, b)
    return out[:N] if Np != N else out


# -------------------------- GRU recurrent scan kernel ---------------------- #
def _gru_scan_kernel(x_ref, wih_ref, bih_ref, whh_ref, bhn_ref, h0_ref,
                     out_ref, h_ref, gi_ref):
    # Grid axis 0 = time chunks (sequential carry via h_ref -> "arbitrary").
    c = pl.program_id(0)
    tc, Bp, Hp = out_ref.shape

    @pl.when(c == 0)
    def _():
        h_ref[...] = h0_ref[...]

    # Whole-chunk input projection: one (tc*Bp, Dfeat) @ (Dfeat, 3*Hp) MXU matmul per chunk,
    # biases (b_ih plus folded b_hr/b_hz, plus in_fc contribution on layer 0) already included.
    gi_ref[...] = (
        jnp.dot(x_ref[...], wih_ref[...], preferred_element_type=jnp.float32)
        + bih_ref[...]
    )

    # Hoisted out of the time loop: fused recurrent weight + pre-broadcast b_hn.
    w_hh = whh_ref[...]                                   # (Hp, 3*Hp)
    b_hn = jnp.broadcast_to(bhn_ref[...], (Bp, Hp))       # (Bp, Hp), broadcast once

    def step(t, h):
        # Single fused recurrent matmul -> one MXU issue per timestep.
        gh = jnp.dot(h, w_hh, preferred_element_type=jnp.float32)    # (Bp, 3*Hp)
        row = pl.multiple_of(t * Bp, Bp)
        gi_t = gi_ref[pl.ds(row, Bp), :]                              # (Bp, 3*Hp)
        # PyTorch gate math: r, z, n; b_hn stays inside the r*(...) term.
        r = jax.nn.sigmoid(gi_t[:, 0:Hp] + gh[:, 0:Hp])
        z = jax.nn.sigmoid(gi_t[:, Hp:2 * Hp] + gh[:, Hp:2 * Hp])
        n = jnp.tanh(gi_t[:, 2 * Hp:3 * Hp] + r * (gh[:, 2 * Hp:3 * Hp] + b_hn))
        h_new = (1.0 - z) * n + z * h
        out_ref[t] = h_new
        return h_new

    h_ref[...] = jax.lax.fori_loop(0, tc, step, h_ref[...], unroll=min(tc, 8))


def gru_layer(x_flat, wih_cat, bih_cat, whh_cat, bhn, h0, time_chunk):
    """x_flat: (Tpad*Bp, Dfeat); wih_cat: (Dfeat, 3Hp); bih_cat: (1, 3Hp);
    whh_cat: (Hp, 3Hp); bhn: (1, Hp); h0: (Bp, Hp)  ->  out: (Tpad, Bp, Hp)."""
    NB, Dfeat = x_flat.shape
    Bp, Hp = h0.shape
    tc = time_chunk
    Tpad = NB // Bp
    return pl.pallas_call(
        _gru_scan_kernel,
        grid=(Tpad // tc,),
        in_specs=[
            pl.BlockSpec((tc * Bp, Dfeat), lambda c: (c, 0)),   # x chunk
            pl.BlockSpec((Dfeat, 3 * Hp), lambda c: (0, 0)),    # fused input weights (resident)
            pl.BlockSpec((1, 3 * Hp), lambda c: (0, 0)),        # fused input bias
            pl.BlockSpec((Hp, 3 * Hp), lambda c: (0, 0)),       # fused recurrent weights (resident)
            pl.BlockSpec((1, Hp), lambda c: (0, 0)),            # b_hn
            pl.BlockSpec((Bp, Hp), lambda c: (0, 0)),           # h0
        ],
        out_specs=pl.BlockSpec((tc, Bp, Hp), lambda c: (c, 0, 0)),
        out_shape=jax.ShapeDtypeStruct((Tpad, Bp, Hp), jnp.float32),
        scratch_shapes=[
            pltpu.VMEM((Bp, Hp), jnp.float32),                  # hidden-state carry
            pltpu.VMEM((tc * Bp, 3 * Hp), jnp.float32),         # per-chunk gi buffer
        ],
        compiler_params=pltpu.CompilerParams(
            dimension_semantics=("arbitrary",),
            vmem_limit_bytes=48 * 1024 * 1024,   # headroom, stays under v7x's 64 MiB physical
        ),
    )(x_flat, wih_cat, bih_cat, whh_cat, bhn, h0)


# --------------------------- host-side weight packing ---------------------- #
def _pack_w_cat(w3, rows_to, cols_to):
    """w3: (3, r, c) -> (rows_to, 3*cols_to); per-gate zero-pad then concat (lane-aligned gates)."""
    r, c = w3.shape[1], w3.shape[2]
    blocks = [jnp.pad(w3[g], ((0, rows_to - r), (0, cols_to - c))) for g in range(3)]
    return jnp.concatenate(blocks, axis=1)


def _pack_b_cat(b_list, cols_to):
    """b_list: 3 arrays of (1, c) -> (1, 3*cols_to)."""
    c = b_list[0].shape[1]
    blocks = [jnp.pad(b, ((0, 0), (0, cols_to - c))) for b in b_list]
    return jnp.concatenate(blocks, axis=1)


# ------------------------------- Model ------------------------------------ #
def init_params(key, input_size, hidden_size, num_layers):
    """Synthetic init mirroring the PyTorch module's shapes.

    GRU weights are stored gate-major: wih/whh are (3, H, H) with gates [r, z, n].
    """
    keys = jax.random.split(key, 2 + 4 * num_layers)
    init_range = 0.1
    k = 1.0 / float(hidden_size) ** 0.5
    params = {
        "in_fc_w": jax.random.uniform(keys[0], (input_size, hidden_size),
                                      jnp.float32, -init_range, init_range),
        "in_fc_b": jnp.zeros((1, hidden_size), jnp.float32),
        "sm_fc_w": jax.random.uniform(keys[1], (hidden_size, input_size),
                                      jnp.float32, -init_range, init_range),
        "sm_fc_b": jnp.zeros((1, input_size), jnp.float32),
        "rnn": [],
    }
    for l in range(num_layers):
        kk = keys[2 + 4 * l: 2 + 4 * (l + 1)]
        params["rnn"].append({
            "wih": jax.random.uniform(kk[0], (3, hidden_size, hidden_size),
                                      jnp.float32, -k, k),
            "whh": jax.random.uniform(kk[1], (3, hidden_size, hidden_size),
                                      jnp.float32, -k, k),
            "bih": jax.random.uniform(kk[2], (3, 1, hidden_size),
                                      jnp.float32, -k, k),
            "bhh": jax.random.uniform(kk[3], (3, 1, hidden_size),
                                      jnp.float32, -k, k),
        })
    return params


@jax.jit
def gru_forward(params, inputs, hidden):
    """inputs: (T, B, input_size); hidden: (num_layers, B, hidden_size)."""
    T, B, Din = inputs.shape
    H = params["in_fc_w"].shape[1]
    Dout = params["sm_fc_w"].shape[1]

    # Pad to TPU-friendly shapes (zero padding is exact: padded hidden columns stay 0).
    Hp = _round_up(H, LANE)
    Bp = _round_up(B, SUBLANE)
    Op = _round_up(Dout, LANE)
    Dp = _round_up(Din, LANE)

    tc = min(T, TIME_CHUNK)
    Tpad = _round_up(T, tc)

    # Raw input, padded and flattened; padded timesteps compute throwaway states (discarded).
    x = jnp.pad(inputs, ((0, Tpad - T), (0, Bp - B), (0, Dp - Din)))   # (Tpad, Bp, Dp)
    x_flat = x.reshape(Tpad * Bp, Dp)
    h0s = jnp.pad(hidden, ((0, 0), (0, Bp - B), (0, Hp - H)))          # (L, Bp, Hp)

    sm_w = jnp.pad(params["sm_fc_w"], ((0, Hp - H), (0, Op - Dout)))
    sm_b = jnp.pad(params["sm_fc_b"], ((0, 0), (0, Op - Dout)))

    h_lasts = []
    for l, layer in enumerate(params["rnn"]):
        if l == 0:
            # Compose in_fc into layer 0's input projection (both affine, no nonlinearity between).
            w_in = jnp.stack([params["in_fc_w"] @ layer["wih"][g] for g in range(3)])
            b_base = [params["in_fc_b"] @ layer["wih"][g] + layer["bih"][g] for g in range(3)]
            rows_p = Dp
        else:
            w_in = layer["wih"]
            b_base = [layer["bih"][g] for g in range(3)]
            rows_p = Hp

        # Fold recurrent biases b_hr / b_hz into the precomputed input-side bias (r, z gates only).
        b_in = [b_base[0] + layer["bhh"][0], b_base[1] + layer["bhh"][1], b_base[2]]

        wih_cat = _pack_w_cat(w_in, rows_p, Hp)        # (rows_p, 3Hp), gates [r, z, n]
        bih_cat = _pack_b_cat(b_in, Hp)                # (1, 3Hp)
        whh_cat = _pack_w_cat(layer["whh"], Hp, Hp)    # (Hp, 3Hp)
        bhn = jnp.pad(layer["bhh"][2], ((0, 0), (0, Hp - H)))   # (1, Hp), stays inside r*(...)

        out = gru_layer(x_flat, wih_cat, bih_cat, whh_cat, bhn, h0s[l], tc)  # (Tpad, Bp, Hp)
        h_lasts.append(out[T - 1])
        x_flat = out.reshape(Tpad * Bp, Hp)

    # TODO(synk): nn.Dropout / inter-layer GRU dropout omitted (inference, dp_keep_prob=1.0).

    # sm_fc over the real timesteps only.
    logits = linear(out[:T].reshape(T * Bp, Hp), sm_w, sm_b).reshape(T, Bp, Op)
    logits = logits[:, :B, :Dout]
    hidden_out = jnp.stack(h_lasts, axis=0)[:, :B, :H]
    return logits, hidden_out


# --------------------------- pure-JAX reference ---------------------------- #
def _gru_forward_ref(params, inputs, hidden):
    T, B, _ = inputs.shape
    H = params["in_fc_w"].shape[1]
    x = inputs.reshape(T * B, -1) @ params["in_fc_w"] + params["in_fc_b"]
    x = x.reshape(T, B, H)
    h_lasts = []
    for l, layer in enumerate(params["rnn"]):
        h = hidden[l]
        outs = []
        for t in range(T):
            xt = x[t]
            r = jax.nn.sigmoid(xt @ layer["wih"][0] + layer["bih"][0]
                               + h @ layer["whh"][0] + layer["bhh"][0])
            z = jax.nn.sigmoid(xt @ layer["wih"][1] + layer["bih"][1]
                               + h @ layer["whh"][1] + layer["bhh"][1])
            n = jnp.tanh(xt @ layer["wih"][2] + layer["bih"][2]
                         + r * (h @ layer["whh"][2] + layer["bhh"][2]))
            h = (1.0 - z) * n + z * h
            outs.append(h)
        x = jnp.stack(outs, axis=0)
        h_lasts.append(h)
    logits = x.reshape(T * B, H) @ params["sm_fc_w"] + params["sm_fc_b"]
    return logits.reshape(T, B, -1), jnp.stack(h_lasts, axis=0)


# --------------------------------- main ------------------------------------ #
if __name__ == "__main__":
    input_size = 4
    hidden_size = 32
    seq_len = 8
    batch_size = 2
    num_layers = 2

    key = jax.random.PRNGKey(0)
    pkey, xkey = jax.random.split(key)
    params = init_params(pkey, input_size, hidden_size, num_layers)

    inputs = jax.random.normal(xkey, (seq_len, batch_size, input_size), jnp.float32)
    hidden = jnp.zeros((num_layers, batch_size, hidden_size), jnp.float32)  # init_hidden()

    logits, hidden_out = gru_forward(params, inputs, hidden)
    jax.block_until_ready((logits, hidden_out))

    assert logits.shape == (seq_len, batch_size, input_size)
    assert hidden_out.shape == (num_layers, batch_size, hidden_size)

    ref_logits, ref_hidden = _gru_forward_ref(params, inputs, hidden)
    assert jnp.allclose(logits, ref_logits, rtol=1e-4, atol=1e-4)
    assert jnp.allclose(hidden_out, ref_hidden, rtol=1e-4, atol=1e-4)

    print("KERNEL_OK")
</pallas_src>

<mosaic_0001>
module attributes {stable_mosaic.version = 11 : i64} {
  func.func @_gru_scan_kernel(%arg0: i32, %arg1: memref<64x128xf32, #tpu.memory_space<vmem>>, %arg2: memref<128x384xf32, #tpu.memory_space<vmem>>, %arg3: memref<1x384xf32, #tpu.memory_space<vmem>>, %arg4: memref<128x384xf32, #tpu.memory_space<vmem>>, %arg5: memref<1x128xf32, #tpu.memory_space<vmem>>, %arg6: memref<8x128xf32, #tpu.memory_space<vmem>>, %arg7: memref<8x8x128xf32, #tpu.memory_space<vmem>>, %arg8: memref<8x128xf32, #tpu.memory_space<vmem>>, %arg9: memref<64x384xf32, #tpu.memory_space<vmem>>) attributes {dimension_semantics = [#tpu.dimension_semantics<arbitrary>], iteration_bounds = array<i64: 1>, scalar_prefetch = 0 : i64, scratch_operands = 2 : i64, tpu.core_type = #tpu.core_type<tc>, window_params = [{transform_indices = @transform_0, window_bounds = array<i64: 64, 128>}, {pipeline_mode = #tpu.pipeline_mode<synchronous>, transform_indices = @transform_1, window_bounds = array<i64: 128, 384>}, {pipeline_mode = #tpu.pipeline_mode<synchronous>, transform_indices = @transform_2, window_bounds = array<i64: 1, 384>}, {pipeline_mode = #tpu.pipeline_mode<synchronous>, transform_indices = @transform_3, window_bounds = array<i64: 128, 384>}, {pipeline_mode = #tpu.pipeline_mode<synchronous>, transform_indices = @transform_4, window_bounds = array<i64: 1, 128>}, {pipeline_mode = #tpu.pipeline_mode<synchronous>, transform_indices = @transform_5, window_bounds = array<i64: 8, 128>}, {transform_indices = @transform_6, window_bounds = array<i64: 8, 8, 128>}]} {
    %c0_i32 = arith.constant 0 : i32
    %0 = arith.cmpi eq, %arg0, %c0_i32 : i32
    %1 = arith.extui %0 : i1 to i32
    %c0_i32_0 = arith.constant 0 : i32
    %2 = arith.cmpi ne, %1, %c0_i32_0 : i32
    scf.if %2 {
      %c0_81 = arith.constant 0 : index
      %c0_82 = arith.constant 0 : index
      %304 = vector.load %arg6[%c0_81, %c0_82] : memref<8x128xf32, #tpu.memory_space<vmem>>, vector<8x128xf32>
      %c0_83 = arith.constant 0 : index
      %c0_84 = arith.constant 0 : index
      %305 = vector.load %arg8[%c0_83, %c0_84] : memref<8x128xf32, #tpu.memory_space<vmem>>, vector<8x128xf32>
      tpu.vector_store %arg8[%c0_83, %c0_84], %304 {strides = array<i32>} : memref<8x128xf32, #tpu.memory_space<vmem>>, vector<8x128xf32>,
    } else {
    }
    %c0 = arith.constant 0 : index
    %c0_1 = arith.constant 0 : index
    %3 = vector.load %arg1[%c0, %c0_1] : memref<64x128xf32, #tpu.memory_space<vmem>>, vector<64x128xf32>
    %c0_2 = arith.constant 0 : index
    %c0_3 = arith.constant 0 : index
    %4 = vector.load %arg2[%c0_2, %c0_3] : memref<128x384xf32, #tpu.memory_space<vmem>>, vector<128x384xf32>
    %cst = arith.constant dense<0.000000e+00> : vector<64x384xf32>
    %5 = tpu.matmul %3, %4, %cst {dimension_numbers = #tpu.dot_dimension_numbers<[1], [0], [0], [1], [0, 0, 1, 1], [], []>} : vector<64x128xf32>, vector<128x384xf32>, vector<64x384xf32> -> vector<64x384xf32>
    %c0_4 = arith.constant 0 : index
    %c0_5 = arith.constant 0 : index
    %6 = vector.load %arg3[%c0_4, %c0_5] : memref<1x384xf32, #tpu.memory_space<vmem>>, vector<1x384xf32>
    %7 = vector.broadcast %6 : vector<1x384xf32> to vector<64x384xf32>
    %8 = arith.addf %5, %7 : vector<64x384xf32>
    %c0_6 = arith.constant 0 : index
    %c0_7 = arith.constant 0 : index
    %9 = vector.load %arg9[%c0_6, %c0_7] : memref<64x384xf32, #tpu.memory_space<vmem>>, vector<64x384xf32>
    tpu.vector_store %arg9[%c0_6, %c0_7], %8 {strides = array<i32>} : memref<64x384xf32, #tpu.memory_space<vmem>>, vector<64x384xf32>,
    %c0_8 = arith.constant 0 : index
    %c0_9 = arith.constant 0 : index
    %10 = vector.load %arg4[%c0_8, %c0_9] : memref<128x384xf32, #tpu.memory_space<vmem>>, vector<128x384xf32>
    %c0_10 = arith.constant 0 : index
    %c0_11 = arith.constant 0 : index
    %11 = vector.load %arg5[%c0_10, %c0_11] : memref<1x128xf32, #tpu.memory_space<vmem>>, vector<1x128xf32>
    %12 = vector.shape_cast %11 : vector<1x128xf32> to vector<1x128xf32>
    %13 = vector.broadcast %12 : vector<1x128xf32> to vector<8x128xf32>
    %c0_12 = arith.constant 0 : index
    %c0_13 = arith.constant 0 : index
    %14 = vector.load %arg8[%c0_12, %c0_13] : memref<8x128xf32, #tpu.memory_space<vmem>>, vector<8x128xf32>
    %c0_i32_14 = arith.constant 0 : i32
    %cst_15 = arith.constant dense<0.000000e+00> : vector<8x384xf32>
    %15 = tpu.matmul %14, %10, %cst_15 {dimension_numbers = #tpu.dot_dimension_numbers<[1], [0], [0], [1], [0, 0, 1, 1], [], []>} : vector<8x128xf32>, vector<128x384xf32>, vector<8x384xf32> -> vector<8x384xf32>
    %c8_i32 = arith.constant 8 : i32
    %16 = arith.muli %c0_i32_14, %c8_i32 : i32
    %17 = tpu.assume_multiple %16, 8 : i32
    %18 = arith.index_cast %17 : i32 to index
    %c0_16 = arith.constant 0 : index
    %19 = vector.load %arg9[%18, %c0_16] : memref<64x384xf32, #tpu.memory_space<vmem>>, vector<8x384xf32>
    %20 = vector.extract_strided_slice %19 {offsets = [0, 0], sizes = [8, 128], strides = [1, 1]} : vector<8x384xf32> to vector<8x128xf32>
    %21 = vector.extract_strided_slice %15 {offsets = [0, 0], sizes = [8, 128], strides = [1, 1]} : vector<8x384xf32> to vector<8x128xf32>
    %22 = arith.addf %20, %21 : vector<8x128xf32>
    %23 = arith.negf %22 : vector<8x128xf32>
    %24 = math.exp %23 : vector<8x128xf32>
    %cst_17 = arith.constant 1.000000e+00 : f32
    %25 = vector.broadcast %cst_17 : f32 to vector<8x128xf32>
    %26 = arith.addf %25, %24 : vector<8x128xf32>
    %27 = arith.divf %25, %26 : vector<8x128xf32>
    %28 = vector.extract_strided_slice %19 {offsets = [0, 128], sizes = [8, 128], strides = [1, 1]} : vector<8x384xf32> to vector<8x128xf32>
    %29 = vector.extract_strided_slice %15 {offsets = [0, 128], sizes = [8, 128], strides = [1, 1]} : vector<8x384xf32> to vector<8x128xf32>
    %30 = arith.addf %28, %29 : vector<8x128xf32>
    %31 = arith.negf %30 : vector<8x128xf32>
    %32 = math.exp %31 : vector<8x128xf32>
    %cst_18 = arith.constant 1.000000e+00 : f32
    %33 = vector.broadcast %cst_18 : f32 to vector<8x128xf32>
    %34 = arith.addf %33, %32 : vector<8x128xf32>
    %35 = arith.divf %33, %34 : vector<8x128xf32>
    %36 = vector.extract_strided_slice %19 {offsets = [0, 256], sizes = [8, 128], strides = [1, 1]} : vector<8x384xf32> to vector<8x128xf32>
    %37 = vector.extract_strided_slice %15 {offsets = [0, 256], sizes = [8, 128], strides = [1, 1]} : vector<8x384xf32> to vector<8x128xf32>
    %38 = arith.addf %37, %13 : vector<8x128xf32>
    %39 = arith.mulf %27, %38 : vector<8x128xf32>
    %40 = arith.addf %36, %39 : vector<8x128xf32>
    %41 = math.tanh %40 : vector<8x128xf32>
    %cst_19 = arith.constant 1.000000e+00 : f32
    %42 = vector.broadcast %cst_19 : f32 to vector<8x128xf32>
    %43 = arith.subf %42, %35 : vector<8x128xf32>
    %44 = arith.mulf %43, %41 : vector<8x128xf32>
    %45 = arith.mulf %35, %14 : vector<8x128xf32>
    %46 = arith.addf %44, %45 : vector<8x128xf32>
    %47 = arith.index_cast %c0_i32_14 : i32 to index
    %c0_20 = arith.constant 0 : index
    %c0_21 = arith.constant 0 : index
    %48 = vector.load %arg7[%47, %c0_20, %c0_21] : memref<8x8x128xf32, #tpu.memory_space<vmem>>, vector<1x8x128xf32>
    %49 = vector.shape_cast %48 : vector<1x8x128xf32> to vector<8x128xf32>
    %50 = vector.shape_cast %46 : vector<8x128xf32> to vector<1x8x128xf32>
    tpu.vector_store %arg7[%47, %c0_20, %c0_21], %50 {strides = array<i32>} : memref<8x8x128xf32, #tpu.memory_space<vmem>>, vector<1x8x128xf32>,
    %c1_i32 = arith.constant 1 : i32
    %cst_22 = arith.constant dense<0.000000e+00> : vector<8x384xf32>
    %51 = tpu.matmul %46, %10, %cst_22 {dimension_numbers = #tpu.dot_dimension_numbers<[1], [0], [0], [1], [0, 0, 1, 1], [], []>} : vector<8x128xf32>, vector<128x384xf32>, vector<8x384xf32> -> vector<8x384xf32>
    %c8_i32_23 = arith.constant 8 : i32
    %52 = arith.muli %c1_i32, %c8_i32_23 : i32
    %53 = tpu.assume_multiple %52, 8 : i32
    %54 = arith.index_cast %53 : i32 to index
    %c0_24 = arith.constant 0 : index
    %55 = vector.load %arg9[%54, %c0_24] : memref<64x384xf32, #tpu.memory_space<vmem>>, vector<8x384xf32>
    %56 = vector.extract_strided_slice %55 {offsets = [0, 0], sizes = [8, 128], strides = [1, 1]} : vector<8x384xf32> to vector<8x128xf32>
    %57 = vector.extract_strided_slice %51 {offsets = [0, 0], sizes = [8, 128], strides = [1, 1]} : vector<8x384xf32> to vector<8x128xf32>
    %58 = arith.addf %56, %57 : vector<8x128xf32>
    %59 = arith.negf %58 : vector<8x128xf32>
    %60 = math.exp %59 : vector<8x128xf32>
    %cst_25 = arith.constant 1.000000e+00 : f32
    %61 = vector.broadcast %cst_25 : f32 to vector<8x128xf32>
    %62 = arith.addf %61, %60 : vector<8x128xf32>
    %63 = arith.divf %61, %62 : vector<8x128xf32>
    %64 = vector.extract_strided_slice %55 {offsets = [0, 128], sizes = [8, 128], strides = [1, 1]} : vector<8x384xf32> to vector<8x128xf32>
    %65 = vector.extract_strided_slice %51 {offsets = [0, 128], sizes = [8, 128], strides = [1, 1]} : vector<8x384xf32> to vector<8x128xf32>
    %66 = arith.addf %64, %65 : vector<8x128xf32>
    %67 = arith.negf %66 : vector<8x128xf32>
    %68 = math.exp %67 : vector<8x128xf32>
    %cst_26 = arith.constant 1.000000e+00 : f32
    %69 = vector.broadcast %cst_26 : f32 to vector<8x128xf32>
    %70 = arith.addf %69, %68 : vector<8x128xf32>
    %71 = arith.divf %69, %70 : vector<8x128xf32>
    %72 = vector.extract_strided_slice %55 {offsets = [0, 256], sizes = [8, 128], strides = [1, 1]} : vector<8x384xf32> to vector<8x128xf32>
    %73 = vector.extract_strided_slice %51 {offsets = [0, 256], sizes = [8, 128], strides = [1, 1]} : vector<8x384xf32> to vector<8x128xf32>
    %74 = arith.addf %73, %13 : vector<8x128xf32>
    %75 = arith.mulf %63, %74 : vector<8x128xf32>
    %76 = arith.addf %72, %75 : vector<8x128xf32>
    %77 = math.tanh %76 : vector<8x128xf32>
    %cst_27 = arith.constant 1.000000e+00 : f32
    %78 = vector.broadcast %cst_27 : f32 to vector<8x128xf32>
    %79 = arith.subf %78, %71 : vector<8x128xf32>
    %80 = arith.mulf %79, %77 : vector<8x128xf32>
    %81 = arith.mulf %71, %46 : vector<8x128xf32>
    %82 = arith.addf %80, %81 : vector<8x128xf32>
    %83 = arith.index_cast %c1_i32 : i32 to index
    %c0_28 = arith.constant 0 : index
    %c0_29 = arith.constant 0 : index
    %84 = vector.load %arg7[%83, %c0_28, %c0_29] : memref<8x8x128xf32, #tpu.memory_space<vmem>>, vector<1x8x128xf32>
    %85 = vector.shape_cast %84 : vector<1x8x128xf32> to vector<8x128xf32>
    %86 = vector.shape_cast %82 : vector<8x128xf32> to vector<1x8x128xf32>
    tpu.vector_store %arg7[%83, %c0_28, %c0_29], %86 {strides = array<i32>} : memref<8x8x128xf32, #tpu.memory_space<vmem>>, vector<1x8x128xf32>,
    %c2_i32 = arith.constant 2 : i32
    %cst_30 = arith.constant dense<0.000000e+00> : vector<8x384xf32>
    %87 = tpu.matmul %82, %10, %cst_30 {dimension_numbers = #tpu.dot_dimension_numbers<[1], [0], [0], [1], [0, 0, 1, 1], [], []>} : vector<8x128xf32>, vector<128x384xf32>, vector<8x384xf32> -> vector<8x384xf32>
    %c8_i32_31 = arith.constant 8 : i32
    %88 = arith.muli %c2_i32, %c8_i32_31 : i32
    %89 = tpu.assume_multiple %88, 8 : i32
    %90 = arith.index_cast %89 : i32 to index
    %c0_32 = arith.constant 0 : index
    %91 = vector.load %arg9[%90, %c0_32] : memref<64x384xf32, #tpu.memory_space<vmem>>, vector<8x384xf32>
    %92 = vector.extract_strided_slice %91 {offsets = [0, 0], sizes = [8, 128], strides = [1, 1]} : vector<8x384xf32> to vector<8x128xf32>
    %93 = vector.extract_strided_slice %87 {offsets = [0, 0], sizes = [8, 128], strides = [1, 1]} : vector<8x384xf32> to vector<8x128xf32>
    %94 = arith.addf %92, %93 : vector<8x128xf32>
    %95 = arith.negf %94 : vector<8x128xf32>
    %96 = math.exp %95 : vector<8x128xf32>
    %cst_33 = arith.constant 1.000000e+00 : f32
    %97 = vector.broadcast %cst_33 : f32 to vector<8x128xf32>
    %98 = arith.addf %97, %96 : vector<8x128xf32>
    %99 = arith.divf %97, %98 : vector<8x128xf32>
    %100 = vector.extract_strided_slice %91 {offsets = [0, 128], sizes = [8, 128], strides = [1, 1]} : vector<8x384xf32> to vector<8x128xf32>
    %101 = vector.extract_strided_slice %87 {offsets = [0, 128], sizes = [8, 128], strides = [1, 1]} : vector<8x384xf32> to vector<8x128xf32>
    %102 = arith.addf %100, %101 : vector<8x128xf32>
    %103 = arith.negf %102 : vector<8x128xf32>
    %104 = math.exp %103 : vector<8x128xf32>
    %cst_34 = arith.constant 1.000000e+00 : f32
    %105 = vector.broadcast %cst_34 : f32 to vector<8x128xf32>
    %106 = arith.addf %105, %104 : vector<8x128xf32>
    %107 = arith.divf %105, %106 : vector<8x128xf32>
    %108 = vector.extract_strided_slice %91 {offsets = [0, 256], sizes = [8, 128], strides = [1, 1]} : vector<8x384xf32> to vector<8x128xf32>
    %109 = vector.extract_strided_slice %87 {offsets = [0, 256], sizes = [8, 128], strides = [1, 1]} : vector<8x384xf32> to vector<8x128xf32>
    %110 = arith.addf %109, %13 : vector<8x128xf32>
    %111 = arith.mulf %99, %110 : vector<8x128xf32>
    %112 = arith.addf %108, %111 : vector<8x128xf32>
    %113 = math.tanh %112 : vector<8x128xf32>
    %cst_35 = arith.constant 1.000000e+00 : f32
    %114 = vector.broadcast %cst_35 : f32 to vector<8x128xf32>
    %115 = arith.subf %114, %107 : vector<8x128xf32>
    %116 = arith.mulf %115, %113 : vector<8x128xf32>
    %117 = arith.mulf %107, %82 : vector<8x128xf32>
    %118 = arith.addf %116, %117 : vector<8x128xf32>
    %119 = arith.index_cast %c2_i32 : i32 to index
    %c0_36 = arith.constant 0 : index
    %c0_37 = arith.constant 0 : index
    %120 = vector.load %arg7[%119, %c0_36, %c0_37] : memref<8x8x128xf32, #tpu.memory_space<vmem>>, vector<1x8x128xf32>
    %121 = vector.shape_cast %120 : vector<1x8x128xf32> to vector<8x128xf32>
    %122 = vector.shape_cast %118 : vector<8x128xf32> to vector<1x8x128xf32>
    tpu.vector_store %arg7[%119, %c0_36, %c0_37], %122 {strides = array<i32>} : memref<8x8x128xf32, #tpu.memory_space<vmem>>, vector<1x8x128xf32>,
    %c3_i32 = arith.constant 3 : i32
    %cst_38 = arith.constant dense<0.000000e+00> : vector<8x384xf32>
    %123 = tpu.matmul %118, %10, %cst_38 {dimension_numbers = #tpu.dot_dimension_numbers<[1], [0], [0], [1], [0, 0, 1, 1], [], []>} : vector<8x128xf32>, vector<128x384xf32>, vector<8x384xf32> -> vector<8x384xf32>
    %c8_i32_39 = arith.constant 8 : i32
    %124 = arith.muli %c3_i32, %c8_i32_39 : i32
    %125 = tpu.assume_multiple %124, 8 : i32
    %126 = arith.index_cast %125 : i32 to index
    %c0_40 = arith.constant 0 : index
    %127 = vector.load %arg9[%126, %c0_40] : memref<64x384xf32, #tpu.memory_space<vmem>>, vector<8x384xf32>
    %128 = vector.extract_strided_slice %127 {offsets = [0, 0], sizes = [8, 128], strides = [1, 1]} : vector<8x384xf32> to vector<8x128xf32>
    %129 = vector.extract_strided_slice %123 {offsets = [0, 0], sizes = [8, 128], strides = [1, 1]} : vector<8x384xf32> to vector<8x128xf32>
    %130 = arith.addf %128, %129 : vector<8x128xf32>
    %131 = arith.negf %130 : vector<8x128xf32>
    %132 = math.exp %131 : vector<8x128xf32>
    %cst_41 = arith.constant 1.000000e+00 : f32
    %133 = vector.broadcast %cst_41 : f32 to vector<8x128xf32>
    %134 = arith.addf %133, %132 : vector<8x128xf32>
    %135 = arith.divf %133, %134 : vector<8x128xf32>
    %136 = vector.extract_strided_slice %127 {offsets = [0, 128], sizes = [8, 128], strides = [1, 1]} : vector<8x384xf32> to vector<8x128xf32>
    %137 = vector.extract_strided_slice %123 {offsets = [0, 128], sizes = [8, 128], strides = [1, 1]} : vector<8x384xf32> to vector<8x128xf32>
    %138 = arith.addf %136, %137 : vector<8x128xf32>
    %139 = arith.negf %138 : vector<8x128xf32>
    %140 = math.exp %139 : vector<8x128xf32>
    %cst_42 = arith.constant 1.000000e+00 : f32
    %141 = vector.broadcast %cst_42 : f32 to vector<8x128xf32>
    %142 = arith.addf %141, %140 : vector<8x128xf32>
    %143 = arith.divf %141, %142 : vector<8x128xf32>
    %144 = vector.extract_strided_slice %127 {offsets = [0, 256], sizes = [8, 128], strides = [1, 1]} : vector<8x384xf32> to vector<8x128xf32>
    %145 = vector.extract_strided_slice %123 {offsets = [0, 256], sizes = [8, 128], strides = [1, 1]} : vector<8x384xf32> to vector<8x128xf32>
    %146 = arith.addf %145, %13 : vector<8x128xf32>
    %147 = arith.mulf %135, %146 : vector<8x128xf32>
    %148 = arith.addf %144, %147 : vector<8x128xf32>
    %149 = math.tanh %148 : vector<8x128xf32>
    %cst_43 = arith.constant 1.000000e+00 : f32
    %150 = vector.broadcast %cst_43 : f32 to vector<8x128xf32>
    %151 = arith.subf %150, %143 : vector<8x128xf32>
    %152 = arith.mulf %151, %149 : vector<8x128xf32>
    %153 = arith.mulf %143, %118 : vector<8x128xf32>
    %154 = arith.addf %152, %153 : vector<8x128xf32>
    %155 = arith.index_cast %c3_i32 : i32 to index
    %c0_44 = arith.constant 0 : index
    %c0_45 = arith.constant 0 : index
    %156 = vector.load %arg7[%155, %c0_44, %c0_45] : memref<8x8x128xf32, #tpu.memory_space<vmem>>, vector<1x8x128xf32>
    %157 = vector.shape_cast %156 : vector<1x8x128xf32> to vector<8x128xf32>
    %158 = vector.shape_cast %154 : vector<8x128xf32> to vector<1x8x128xf32>
    tpu.vector_store %arg7[%155, %c0_44, %c0_45], %158 {strides = array<i32>} : memref<8x8x128xf32, #tpu.memory_space<vmem>>, vector<1x8x128xf32>,
    %c4_i32 = arith.constant 4 : i32
    %cst_46 = arith.constant dense<0.000000e+00> : vector<8x384xf32>
    %159 = tpu.matmul %154, %10, %cst_46 {dimension_numbers = #tpu.dot_dimension_numbers<[1], [0], [0], [1], [0, 0, 1, 1], [], []>} : vector<8x128xf32>, vector<128x384xf32>, vector<8x384xf32> -> vector<8x384xf32>
    %c8_i32_47 = arith.constant 8 : i32
    %160 = arith.muli %c4_i32, %c8_i32_47 : i32
    %161 = tpu.assume_multiple %160, 8 : i32
    %162 = arith.index_cast %161 : i32 to index
    %c0_48 = arith.constant 0 : index
    %163 = vector.load %arg9[%162, %c0_48] : memref<64x384xf32, #tpu.memory_space<vmem>>, vector<8x384xf32>
    %164 = vector.extract_strided_slice %163 {offsets = [0, 0], sizes = [8, 128], strides = [1, 1]} : vector<8x384xf32> to vector<8x128xf32>
    %165 = vector.extract_strided_slice %159 {offsets = [0, 0], sizes = [8, 128], strides = [1, 1]} : vector<8x384xf32> to vector<8x128xf32>
    %166 = arith.addf %164, %165 : vector<8x128xf32>
    %167 = arith.negf %166 : vector<8x128xf32>
    %168 = math.exp %167 : vector<8x128xf32>
    %cst_49 = arith.constant 1.000000e+00 : f32
    %169 = vector.broadcast %cst_49 : f32 to vector<8x128xf32>
    %170 = arith.addf %169, %168 : vector<8x128xf32>
    %171 = arith.divf %169, %170 : vector<8x128xf32>
    %172 = vector.extract_strided_slice %163 {offsets = [0, 128], sizes = [8, 128], strides = [1, 1]} : vector<8x384xf32> to vector<8x128xf32>
    %173 = vector.extract_strided_slice %159 {offsets = [0, 128], sizes = [8, 128], strides = [1, 1]} : vector<8x384xf32> to vector<8x128xf32>
    %174 = arith.addf %172, %173 : vector<8x128xf32>
    %175 = arith.negf %174 : vector<8x128xf32>
    %176 = math.exp %175 : vector<8x128xf32>
    %cst_50 = arith.constant 1.000000e+00 : f32
    %177 = vector.broadcast %cst_50 : f32 to vector<8x128xf32>
    %178 = arith.addf %177, %176 : vector<8x128xf32>
    %179 = arith.divf %177, %178 : vector<8x128xf32>
    %180 = vector.extract_strided_slice %163 {offsets = [0, 256], sizes = [8, 128], strides = [1, 1]} : vector<8x384xf32> to vector<8x128xf32>
    %181 = vector.extract_strided_slice %159 {offsets = [0, 256], sizes = [8, 128], strides = [1, 1]} : vector<8x384xf32> to vector<8x128xf32>
    %182 = arith.addf %181, %13 : vector<8x128xf32>
    %183 = arith.mulf %171, %182 : vector<8x128xf32>
    %184 = arith.addf %180, %183 : vector<8x128xf32>
    %185 = math.tanh %184 : vector<8x128xf32>
    %cst_51 = arith.constant 1.000000e+00 : f32
    %186 = vector.broadcast %cst_51 : f32 to vector<8x128xf32>
    %187 = arith.subf %186, %179 : vector<8x128xf32>
    %188 = arith.mulf %187, %185 : vector<8x128xf32>
    %189 = arith.mulf %179, %154 : vector<8x128xf32>
    %190 = arith.addf %188, %189 : vector<8x128xf32>
    %191 = arith.index_cast %c4_i32 : i32 to index
    %c0_52 = arith.constant 0 : index
    %c0_53 = arith.constant 0 : index
    %192 = vector.load %arg7[%191, %c0_52, %c0_53] : memref<8x8x128xf32, #tpu.memory_space<vmem>>, vector<1x8x128xf32>
    %193 = vector.shape_cast %192 : vector<1x8x128xf32> to vector<8x128xf32>
    %194 = vector.shape_cast %190 : vector<8x128xf32> to vector<1x8x128xf32>
    tpu.vector_store %arg7[%191, %c0_52, %c0_53], %194 {strides = array<i32>} : memref<8x8x128xf32, #tpu.memory_space<vmem>>, vector<1x8x128xf32>,
    %c5_i32 = arith.constant 5 : i32
    %cst_54 = arith.constant dense<0.000000e+00> : vector<8x384xf32>
    %195 = tpu.matmul %190, %10, %cst_54 {dimension_numbers = #tpu.dot_dimension_numbers<[1], [0], [0], [1], [0, 0, 1, 1], [], []>} : vector<8x128xf32>, vector<128x384xf32>, vector<8x384xf32> -> vector<8x384xf32>
    %c8_i32_55 = arith.constant 8 : i32
    %196 = arith.muli %c5_i32, %c8_i32_55 : i32
    %197 = tpu.assume_multiple %196, 8 : i32
    %198 = arith.index_cast %197 : i32 to index
    %c0_56 = arith.constant 0 : index
    %199 = vector.load %arg9[%198, %c0_56] : memref<64x384xf32, #tpu.memory_space<vmem>>, vector<8x384xf32>
    %200 = vector.extract_strided_slice %199 {offsets = [0, 0], sizes = [8, 128], strides = [1, 1]} : vector<8x384xf32> to vector<8x128xf32>
    %201 = vector.extract_strided_slice %195 {offsets = [0, 0], sizes = [8, 128], strides = [1, 1]} : vector<8x384xf32> to vector<8x128xf32>
    %202 = arith.addf %200, %201 : vector<8x128xf32>
    %203 = arith.negf %202 : vector<8x128xf32>
    %204 = math.exp %203 : vector<8x128xf32>
    %cst_57 = arith.constant 1.000000e+00 : f32
    %205 = vector.broadcast %cst_57 : f32 to vector<8x128xf32>
    %206 = arith.addf %205, %204 : vector<8x128xf32>
    %207 = arith.divf %205, %206 : vector<8x128xf32>
    %208 = vector.extract_strided_slice %199 {offsets = [0, 128], sizes = [8, 128], strides = [1, 1]} : vector<8x384xf32> to vector<8x128xf32>
    %209 = vector.extract_strided_slice %195 {offsets = [0, 128], sizes = [8, 128], strides = [1, 1]} : vector<8x384xf32> to vector<8x128xf32>
    %210 = arith.addf %208, %209 : vector<8x128xf32>
    %211 = arith.negf %210 : vector<8x128xf32>
    %212 = math.exp %211 : vector<8x128xf32>
    %cst_58 = arith.constant 1.000000e+00 : f32
    %213 = vector.broadcast %cst_58 : f32 to vector<8x128xf32>
    %214 = arith.addf %213, %212 : vector<8x128xf32>
    %215 = arith.divf %213, %214 : vector<8x128xf32>
    %216 = vector.extract_strided_slice %199 {offsets = [0, 256], sizes = [8, 128], strides = [1, 1]} : vector<8x384xf32> to vector<8x128xf32>
    %217 = vector.extract_strided_slice %195 {offsets = [0, 256], sizes = [8, 128], strides = [1, 1]} : vector<8x384xf32> to vector<8x128xf32>
    %218 = arith.addf %217, %13 : vector<8x128xf32>
    %219 = arith.mulf %207, %218 : vector<8x128xf32>
    %220 = arith.addf %216, %219 : vector<8x128xf32>
    %221 = math.tanh %220 : vector<8x128xf32>
    %cst_59 = arith.constant 1.000000e+00 : f32
    %222 = vector.broadcast %cst_59 : f32 to vector<8x128xf32>
    %223 = arith.subf %222, %215 : vector<8x128xf32>
    %224 = arith.mulf %223, %221 : vector<8x128xf32>
    %225 = arith.mulf %215, %190 : vector<8x128xf32>
    %226 = arith.addf %224, %225 : vector<8x128xf32>
    %227 = arith.index_cast %c5_i32 : i32 to index
    %c0_60 = arith.constant 0 : index
    %c0_61 = arith.constant 0 : index
    %228 = vector.load %arg7[%227, %c0_60, %c0_61] : memref<8x8x128xf32, #tpu.memory_space<vmem>>, vector<1x8x128xf32>
    %229 = vector.shape_cast %228 : vector<1x8x128xf32> to vector<8x128xf32>
    %230 = vector.shape_cast %226 : vector<8x128xf32> to vector<1x8x128xf32>
    tpu.vector_store %arg7[%227, %c0_60, %c0_61], %230 {strides = array<i32>} : memref<8x8x128xf32, #tpu.memory_space<vmem>>, vector<1x8x128xf32>,
    %c6_i32 = arith.constant 6 : i32
    %cst_62 = arith.constant dense<0.000000e+00> : vector<8x384xf32>
    %231 = tpu.matmul %226, %10, %cst_62 {dimension_numbers = #tpu.dot_dimension_numbers<[1], [0], [0], [1], [0, 0, 1, 1], [], []>} : vector<8x128xf32>, vector<128x384xf32>, vector<8x384xf32> -> vector<8x384xf32>
    %c8_i32_63 = arith.constant 8 : i32
    %232 = arith.muli %c6_i32, %c8_i32_63 : i32
    %233 = tpu.assume_multiple %232, 8 : i32
    %234 = arith.index_cast %233 : i32 to index
    %c0_64 = arith.constant 0 : index
    %235 = vector.load %arg9[%234, %c0_64] : memref<64x384xf32, #tpu.memory_space<vmem>>, vector<8x384xf32>
    %236 = vector.extract_strided_slice %235 {offsets = [0, 0], sizes = [8, 128], strides = [1, 1]} : vector<8x384xf32> to vector<8x128xf32>
    %237 = vector.extract_strided_slice %231 {offsets = [0, 0], sizes = [8, 128], strides = [1, 1]} : vector<8x384xf32> to vector<8x128xf32>
    %238 = arith.addf %236, %237 : vector<8x128xf32>
    %239 = arith.negf %238 : vector<8x128xf32>
    %240 = math.exp %239 : vector<8x128xf32>
    %cst_65 = arith.constant 1.000000e+00 : f32
    %241 = vector.broadcast %cst_65 : f32 to vector<8x128xf32>
    %242 = arith.addf %241, %240 : vector<8x128xf32>
    %243 = arith.divf %241, %242 : vector<8x128xf32>
    %244 = vector.extract_strided_slice %235 {offsets = [0, 128], sizes = [8, 128], strides = [1, 1]} : vector<8x384xf32> to vector<8x128xf32>
    %245 = vector.extract_strided_slice %231 {offsets = [0, 128], sizes = [8, 128], strides = [1, 1]} : vector<8x384xf32> to vector<8x128xf32>
    %246 = arith.addf %244, %245 : vector<8x128xf32>
    %247 = arith.negf %246 : vector<8x128xf32>
    %248 = math.exp %247 : vector<8x128xf32>
    %cst_66 = arith.constant 1.000000e+00 : f32
    %249 = vector.broadcast %cst_66 : f32 to vector<8x128xf32>
    %250 = arith.addf %249, %248 : vector<8x128xf32>
    %251 = arith.divf %249, %250 : vector<8x128xf32>
    %252 = vector.extract_strided_slice %235 {offsets = [0, 256], sizes = [8, 128], strides = [1, 1]} : vector<8x384xf32> to vector<8x128xf32>
    %253 = vector.extract_strided_slice %231 {offsets = [0, 256], sizes = [8, 128], strides = [1, 1]} : vector<8x384xf32> to vector<8x128xf32>
    %254 = arith.addf %253, %13 : vector<8x128xf32>
    %255 = arith.mulf %243, %254 : vector<8x128xf32>
    %256 = arith.addf %252, %255 : vector<8x128xf32>
    %257 = math.tanh %256 : vector<8x128xf32>
    %cst_67 = arith.constant 1.000000e+00 : f32
    %258 = vector.broadcast %cst_67 : f32 to vector<8x128xf32>
    %259 = arith.subf %258, %251 : vector<8x128xf32>
    %260 = arith.mulf %259, %257 : vector<8x128xf32>
    %261 = arith.mulf %251, %226 : vector<8x128xf32>
    %262 = arith.addf %260, %261 : vector<8x128xf32>
    %263 = arith.index_cast %c6_i32 : i32 to index
    %c0_68 = arith.constant 0 : index
    %c0_69 = arith.constant 0 : index
    %264 = vector.load %arg7[%263, %c0_68, %c0_69] : memref<8x8x128xf32, #tpu.memory_space<vmem>>, vector<1x8x128xf32>
    %265 = vector.shape_cast %264 : vector<1x8x128xf32> to vector<8x128xf32>
    %266 = vector.shape_cast %262 : vector<8x128xf32> to vector<1x8x128xf32>
    tpu.vector_store %arg7[%263, %c0_68, %c0_69], %266 {strides = array<i32>} : memref<8x8x128xf32, #tpu.memory_space<vmem>>, vector<1x8x128xf32>,
    %c7_i32 = arith.constant 7 : i32
    %cst_70 = arith.constant dense<0.000000e+00> : vector<8x384xf32>
    %267 = tpu.matmul %262, %10, %cst_70 {dimension_numbers = #tpu.dot_dimension_numbers<[1], [0], [0], [1], [0, 0, 1, 1], [], []>} : vector<8x128xf32>, vector<128x384xf32>, vector<8x384xf32> -> vector<8x384xf32>
    %c8_i32_71 = arith.constant 8 : i32
    %268 = arith.muli %c7_i32, %c8_i32_71 : i32
    %269 = tpu.assume_multiple %268, 8 : i32
    %270 = arith.index_cast %269 : i32 to index
    %c0_72 = arith.constant 0 : index
    %271 = vector.load %arg9[%270, %c0_72] : memref<64x384xf32, #tpu.memory_space<vmem>>, vector<8x384xf32>
    %272 = vector.extract_strided_slice %271 {offsets = [0, 0], sizes = [8, 128], strides = [1, 1]} : vector<8x384xf32> to vector<8x128xf32>
    %273 = vector.extract_strided_slice %267 {offsets = [0, 0], sizes = [8, 128], strides = [1, 1]} : vector<8x384xf32> to vector<8x128xf32>
    %274 = arith.addf %272, %273 : vector<8x128xf32>
    %275 = arith.negf %274 : vector<8x128xf32>
    %276 = math.exp %275 : vector<8x128xf32>
    %cst_73 = arith.constant 1.000000e+00 : f32
    %277 = vector.broadcast %cst_73 : f32 to vector<8x128xf32>
    %278 = arith.addf %277, %276 : vector<8x128xf32>
    %279 = arith.divf %277, %278 : vector<8x128xf32>
    %280 = vector.extract_strided_slice %271 {offsets = [0, 128], sizes = [8, 128], strides = [1, 1]} : vector<8x384xf32> to vector<8x128xf32>
    %281 = vector.extract_strided_slice %267 {offsets = [0, 128], sizes = [8, 128], strides = [1, 1]} : vector<8x384xf32> to vector<8x128xf32>
    %282 = arith.addf %280, %281 : vector<8x128xf32>
    %283 = arith.negf %282 : vector<8x128xf32>
    %284 = math.exp %283 : vector<8x128xf32>
    %cst_74 = arith.constant 1.000000e+00 : f32
    %285 = vector.broadcast %cst_74 : f32 to vector<8x128xf32>
    %286 = arith.addf %285, %284 : vector<8x128xf32>
    %287 = arith.divf %285, %286 : vector<8x128xf32>
    %288 = vector.extract_strided_slice %271 {offsets = [0, 256], sizes = [8, 128], strides = [1, 1]} : vector<8x384xf32> to vector<8x128xf32>
    %289 = vector.extract_strided_slice %267 {offsets = [0, 256], sizes = [8, 128], strides = [1, 1]} : vector<8x384xf32> to vector<8x128xf32>
    %290 = arith.addf %289, %13 : vector<8x128xf32>
    %291 = arith.mulf %279, %290 : vector<8x128xf32>
    %292 = arith.addf %288, %291 : vector<8x128xf32>
    %293 = math.tanh %292 : vector<8x128xf32>
    %cst_75 = arith.constant 1.000000e+00 : f32
    %294 = vector.broadcast %cst_75 : f32 to vector<8x128xf32>
    %295 = arith.subf %294, %287 : vector<8x128xf32>
    %296 = arith.mulf %295, %293 : vector<8x128xf32>
    %297 = arith.mulf %287, %262 : vector<8x128xf32>
    %298 = arith.addf %296, %297 : vector<8x128xf32>
    %299 = arith.index_cast %c7_i32 : i32 to index
    %c0_76 = arith.constant 0 : index
    %c0_77 = arith.constant 0 : index
    %300 = vector.load %arg7[%299, %c0_76, %c0_77] : memref<8x8x128xf32, #tpu.memory_space<vmem>>, vector<1x8x128xf32>
    %301 = vector.shape_cast %300 : vector<1x8x128xf32> to vector<8x128xf32>
    %302 = vector.shape_cast %298 : vector<8x128xf32> to vector<1x8x128xf32>
    tpu.vector_store %arg7[%299, %c0_76, %c0_77], %302 {strides = array<i32>} : memref<8x8x128xf32, #tpu.memory_space<vmem>>, vector<1x8x128xf32>,
    %c8_i32_78 = arith.constant 8 : i32
    %c0_79 = arith.constant 0 : index
    %c0_80 = arith.constant 0 : index
    %303 = vector.load %arg8[%c0_79, %c0_80] : memref<8x128xf32, #tpu.memory_space<vmem>>, vector<8x128xf32>
    tpu.vector_store %arg8[%c0_79, %c0_80], %298 {strides = array<i32>} : memref<8x128xf32, #tpu.memory_space<vmem>>, vector<8x128xf32>,
    return
  }
  func.func @transform_0(%arg0: i32) -> (i32, i32) {
    %c0_i32 = arith.constant 0 : i32
    %c0_i32_0 = arith.constant 0 : i32
    return %arg0, %c0_i32 : i32, i32
  }
  func.func @transform_1(%arg0: i32) -> (i32, i32) {
    %c0_i32 = arith.constant 0 : i32
    %c0_i32_0 = arith.constant 0 : i32
    %c0_i32_1 = arith.constant 0 : i32
    return %c0_i32, %c0_i32_0 : i32, i32
  }
  func.func @transform_2(%arg0: i32) -> (i32, i32) {
    %c0_i32 = arith.constant 0 : i32
    %c0_i32_0 = arith.constant 0 : i32
    %c0_i32_1 = arith.constant 0 : i32
    return %c0_i32, %c0_i32_0 : i32, i32
  }
  func.func @transform_3(%arg0: i32) -> (i32, i32) {
    %c0_i32 = arith.constant 0 : i32
    %c0_i32_0 = arith.constant 0 : i32
    %c0_i32_1 = arith.constant 0 : i32
    return %c0_i32, %c0_i32_0 : i32, i32
  }
  func.func @transform_4(%arg0: i32) -> (i32, i32) {
    %c0_i32 = arith.constant 0 : i32
    %c0_i32_0 = arith.constant 0 : i32
    %c0_i32_1 = arith.constant 0 : i32
    return %c0_i32, %c0_i32_0 : i32, i32
  }
  func.func @transform_5(%arg0: i32) -> (i32, i32) {
    %c0_i32 = arith.constant 0 : i32
    %c0_i32_0 = arith.constant 0 : i32
    %c0_i32_1 = arith.constant 0 : i32
    return %c0_i32, %c0_i32_0 : i32, i32
  }
  func.func @transform_6(%arg0: i32) -> (i32, i32, i32) {
    %c0_i32 = arith.constant 0 : i32
    %c0_i32_0 = arith.constant 0 : i32
    %c0_i32_1 = arith.constant 0 : i32
    return %arg0, %c0_i32, %c0_i32_0 : i32, i32, i32
  }
}

module attributes {stable_mosaic.version = 11 : i64} {
  func.func @_linear_kernel(%arg0: i32, %arg1: memref<64x128xf32, #tpu.memory_space<vmem>>, %arg2: memref<128x128xf32, #tpu.memory_space<vmem>>, %arg3: memref<1x128xf32, #tpu.memory_space<vmem>>, %arg4: memref<64x128xf32, #tpu.memory_space<vmem>>) attributes {dimension_semantics = [#tpu.dimension_semantics<parallel>], iteration_bounds = array<i64: 1>, scalar_prefetch = 0 : i64, scratch_operands = 0 : i64, tpu.core_type = #tpu.core_type<tc>, window_params = [{transform_indices = @transform_0, window_bounds = array<i64: 64, 128>}, {pipeline_mode = #tpu.pipeline_mode<synchronous>, transform_indices = @transform_1, window_bounds = array<i64: 128, 128>}, {pipeline_mode = #tpu.pipeline_mode<synchronous>, transform_indices = @transform_2, window_bounds = array<i64: 1, 128>}, {transform_indices = @transform_3, window_bounds = array<i64: 64, 128>}]} {
    %c0 = arith.constant 0 : index
    %c0_0 = arith.constant 0 : index
    %0 = vector.load %arg1[%c0, %c0_0] : memref<64x128xf32, #tpu.memory_space<vmem>>, vector<64x128xf32>
    %c0_1 = arith.constant 0 : index
    %c0_2 = arith.constant 0 : index
    %1 = vector.load %arg2[%c0_1, %c0_2] : memref<128x128xf32, #tpu.memory_space<vmem>>, vector<128x128xf32>
    %cst = arith.constant dense<0.000000e+00> : vector<64x128xf32>
    %2 = tpu.matmul %0, %1, %cst {dimension_numbers = #tpu.dot_dimension_numbers<[1], [0], [0], [1], [0, 0, 1, 1], [], []>} : vector<64x128xf32>, vector<128x128xf32>, vector<64x128xf32> -> vector<64x128xf32>
    %c0_3 = arith.constant 0 : index
    %c0_4 = arith.constant 0 : index
    %3 = vector.load %arg3[%c0_3, %c0_4] : memref<1x128xf32, #tpu.memory_space<vmem>>, vector<1x128xf32>
    %4 = vector.broadcast %3 : vector<1x128xf32> to vector<64x128xf32>
    %5 = arith.addf %2, %4 : vector<64x128xf32>
    %c0_5 = arith.constant 0 : index
    %c0_6 = arith.constant 0 : index
    %6 = vector.load %arg4[%c0_5, %c0_6] : memref<64x128xf32, #tpu.memory_space<vmem>>, vector<64x128xf32>
    tpu.vector_store %arg4[%c0_5, %c0_6], %5 {strides = array<i32>} : memref<64x128xf32, #tpu.memory_space<vmem>>, vector<64x128xf32>,
    return
  }
  func.func @transform_0(%arg0: i32) -> (i32, i32) {
    %c0_i32 = arith.constant 0 : i32
    %c0_i32_0 = arith.constant 0 : i32
    return %arg0, %c0_i32 : i32, i32
  }
  func.func @transform_1(%arg0: i32) -> (i32, i32) {
    %c0_i32 = arith.constant 0 : i32
    %c0_i32_0 = arith.constant 0 : i32
    %c0_i32_1 = arith.constant 0 : i32
    return %c0_i32, %c0_i32_0 : i32, i32
  }
  func.func @transform_2(%arg0: i32) -> (i32, i32) {
    %c0_i32 = arith.constant 0 : i32
    %c0_i32_0 = arith.constant 0 : i32
    %c0_i32_1 = arith.constant 0 : i32
    return %c0_i32, %c0_i32_0 : i32, i32
  }
  func.func @transform_3(%arg0: i32) -> (i32, i32) {
    %c0_i32 = arith.constant 0 : i32
    %c0_i32_0 = arith.constant 0 : i32
    return %arg0, %c0_i32 : i32, i32
  }
}

</mosaic_0001>

<bundles_post_ra>
// kernel: gru_forward.5
= control target key start
LH: loop header
LB: loop body
LE: loop exit
PB: predicated region body
PF: predicated region fallthrough
CT: control target
= control target key end

     0   :  { %s263_s1 = inlined_call_operand.vmem [shape: f32[128,128], index: 1, kind: input, shape index: {}]   ;;  %s264_s2 = inlined_call_operand.vmem [shape: f32[1,128], index: 2, kind: input, shape index: {}]   ;;  %s265_s0 = inlined_call_operand.vmem [shape: f32[64,128], index: 0, kind: input, shape index: {}]   ;;  %s266_s3 = inlined_call_operand.vmem [shape: f32[64,128], index: 3, kind: output, shape index: {}]  }
   0x1   :  { %v37_v0 = vld [vmem:[%s263_s1 + $0x78] sm:$0xff]  ;;  %v36_v1 = vld [vmem:[%s263_s1 + $0x70] sm:$0xff]  ;;  %v35_v2 = vld [vmem:[%s263_s1 + $0x68] sm:$0xff] }
   0x2   :  { %96 = vmatpush.msra.mxu2 %v37_v0  ;;  %97 = vmatpush.msra.mxu3 %v37_v0  ;;  %v34_v3 = vld [vmem:[%s263_s1 + $0x60] sm:$0xff]  ;;  %v33_v4 = vld [vmem:[%s263_s1 + $0x58] sm:$0xff]  ;;  %v32_v5 = vld [vmem:[%s263_s1 + $0x50] sm:$0xff] }
   0x3   :  { %42 = vmatpush.msra.mxu0 %v37_v0  ;;  %95 = vmatpush.msra.mxu1 %v37_v0  ;;  %v31_v6 = vld [vmem:[%s263_s1 + $0x48] sm:$0xff]  ;;  %v30_v7 = vld [vmem:[%s263_s1 + $0x40] sm:$0xff]  ;;  %v29_v8 = vld [vmem:[%s263_s1 + $0x38] sm:$0xff] }
   0x4   :  { %99 = vmatpush.msra.mxu2 %v36_v1  ;;  %100 = vmatpush.msra.mxu3 %v36_v1  ;;  %v28_v9 = vld [vmem:[%s263_s1 + $0x30] sm:$0xff]  ;;  %v27_v10 = vld [vmem:[%s263_s1 + $0x28] sm:$0xff]  ;;  %v26_v11 = vld [vmem:[%s263_s1 + $0x20] sm:$0xff] }
   0x5   :  { %43 = vmatpush.msra.mxu0 %v36_v1  ;;  %98 = vmatpush.msra.mxu1 %v36_v1  ;;  %v25_v12 = vld [vmem:[%s263_s1 + $0x18] sm:$0xff]  ;;  %v24_v13 = vld [vmem:[%s263_s1 + $0x10] sm:$0xff]  ;;  %v23_v14 = vld [vmem:[%s263_s1 + $0x8] sm:$0xff] }
   0x6   :  { %102 = vmatpush.msra.mxu2 %v35_v2  ;;  %103 = vmatpush.msra.mxu3 %v35_v2  ;;  %v22_v15 = vld [vmem:[%s263_s1] sm:$0xff]  ;;  %v20_v17 = vld [vmem:[%s265_s0 + $0x30] sm:$0xff]  ;;  %v19_v20 = vld [vmem:[%s265_s0 + $0x28] sm:$0xff] }
   0x7   :  { %44 = vmatpush.msra.mxu0 %v35_v2  ;;  %101 = vmatpush.msra.mxu1 %v35_v2  ;;  %v18_v16 = vld [vmem:[%s265_s0 + $0x20] sm:$0xff]  ;;  %v16_v19 = vld [vmem:[%s265_s0 + $0x10] sm:$0xff]  ;;  %v21_v21 = vld [vmem:[%s265_s0 + $0x38] sm:$0xff] }
   0x8   :  { %105 = vmatpush.msra.mxu2 %v34_v3  ;;  %106 = vmatpush.msra.mxu3 %v34_v3  ;;  %v14_v18 = vld [vmem:[%s265_s0] sm:$0xff]  ;;  %v15_v22 = vld [vmem:[%s265_s0 + $0x8] sm:$0xff]  ;;  %v17_v23 = vld [vmem:[%s265_s0 + $0x18] sm:$0xff] }
   0x9   :  { %45 = vmatpush.msra.mxu0 %v34_v3  ;;  %104 = vmatpush.msra.mxu1 %v34_v3  ;;  %v143_v24 = vld [vmem:[%s264_s2] ss:$0 sm:$0xff] }
   0xa   :  { %108 = vmatpush.msra.mxu2 %v33_v4  ;;  %109 = vmatpush.msra.mxu3 %v33_v4 }
   0xb   :  { %46 = vmatpush.msra.mxu0 %v33_v4  ;;  %107 = vmatpush.msra.mxu1 %v33_v4 }
   0xc   :  { %111 = vmatpush.msra.mxu2 %v32_v5  ;;  %112 = vmatpush.msra.mxu3 %v32_v5 }
   0xd   :  { %47 = vmatpush.msra.mxu0 %v32_v5  ;;  %110 = vmatpush.msra.mxu1 %v32_v5 }
   0xe   :  { %114 = vmatpush.msra.mxu2 %v31_v6  ;;  %115 = vmatpush.msra.mxu3 %v31_v6 }
   0xf   :  { %48 = vmatpush.msra.mxu0 %v31_v6  ;;  %113 = vmatpush.msra.mxu1 %v31_v6 }
  0x10   :  { %117 = vmatpush.msra.mxu2 %v30_v7  ;;  %118 = vmatpush.msra.mxu3 %v30_v7 }
  0x11   :  { %49 = vmatpush.msra.mxu0 %v30_v7  ;;  %116 = vmatpush.msra.mxu1 %v30_v7 }
  0x12   :  { %120 = vmatpush.msra.mxu2 %v29_v8  ;;  %121 = vmatpush.msra.mxu3 %v29_v8 }
  0x13   :  { %50 = vmatpush.msra.mxu0 %v29_v8  ;;  %119 = vmatpush.msra.mxu1 %v29_v8 }
  0x14   :  { %123 = vmatpush.msra.mxu2 %v28_v9  ;;  %124 = vmatpush.msra.mxu3 %v28_v9 }
  0x15   :  { %51 = vmatpush.msra.mxu0 %v28_v9  ;;  %122 = vmatpush.msra.mxu1 %v28_v9 }
  0x16   :  { %126 = vmatpush.msra.mxu2 %v27_v10  ;;  %127 = vmatpush.msra.mxu3 %v27_v10 }
  0x17   :  { %52 = vmatpush.msra.mxu0 %v27_v10  ;;  %125 = vmatpush.msra.mxu1 %v27_v10 }
  0x18   :  { %129 = vmatpush.msra.mxu2 %v26_v11  ;;  %130 = vmatpush.msra.mxu3 %v26_v11 }
  0x19   :  { %53 = vmatpush.msra.mxu0 %v26_v11  ;;  %128 = vmatpush.msra.mxu1 %v26_v11 }
  0x1a   :  { %132 = vmatpush.msra.mxu2 %v25_v12  ;;  %133 = vmatpush.msra.mxu3 %v25_v12 }
  0x1b   :  { %54 = vmatpush.msra.mxu0 %v25_v12  ;;  %131 = vmatpush.msra.mxu1 %v25_v12 }
  0x1c   :  { %135 = vmatpush.msra.mxu2 %v24_v13  ;;  %136 = vmatpush.msra.mxu3 %v24_v13 }
  0x1d   :  { %55 = vmatpush.msra.mxu0 %v24_v13  ;;  %134 = vmatpush.msra.mxu1 %v24_v13 }
  0x1e   :  { %138 = vmatpush.msra.mxu2 %v23_v14  ;;  %139 = vmatpush.msra.mxu3 %v23_v14 }
  0x1f   :  { %56 = vmatpush.msra.mxu0 %v23_v14  ;;  %137 = vmatpush.msra.mxu1 %v23_v14 }
  0x20   :  { %141 = vmatpush.msra.mxu2 %v22_v15  ;;  %142 = vmatpush.msra.mxu3 %v22_v15 }
  0x21   :  { %70 = vmatmul.f32.vlgmr.msra.gmra.mxu2 %v18_v16  ;;  %76 = vmatmul.f32.vlgmr.msra.gmra.mxu3 %v20_v17 }
  0x22   :  { %57 = vmatpush.msra.mxu0 %v22_v15  ;;  %140 = vmatpush.msra.mxu1 %v22_v15 }
  0x23   :  { %58 = vmatmul.f32.vlgmr.msra.gmra.mxu0 %v14_v18  ;;  %64 = vmatmul.f32.vlgmr.msra.gmra.mxu1 %v16_v19 }
  0x29   :  { %73 = vmatmul.f32.gmra.mxu2 %v19_v20  ;;  %79 = vmatmul.f32.gmra.mxu3 %v21_v21 }
  0x2b   :  { %61 = vmatmul.f32.gmra.mxu0 %v15_v22  ;;  %67 = vmatmul.f32.gmra.mxu1 %v17_v23 }
  0xa0   :  { %v59_v25 = vpop.f32.mrf.mxu0  ;;  %v65_v26 = vpop.f32.mrf.mxu1 }
  0xa1   :  { %v60_v27 = vadd.f32 %v143_v24, %v59_v25  ;;  %v66_v28 = vadd.f32 %v143_v24, %v65_v26 }
  0xa3   :  { %83 = vst [vmem:[%s266_s3] sm:$0xff] %v60_v27 }
  0xa4   :  { %85 = vst [vmem:[%s266_s3 + $0x10] sm:$0xff] %v66_v28  ;;  %v71_v29 = vpop.f32.mrf.mxu2  ;;  %v77_v30 = vpop.f32.mrf.mxu3 }
  0xa5   :  { %v72_v31 = vadd.f32 %v143_v24, %v71_v29  ;;  %v78_v32 = vadd.f32 %v143_v24, %v77_v30 }
  0xa7   :  { %87 = vst [vmem:[%s266_s3 + $0x20] sm:$0xff] %v72_v31 }
  0xa8   :  { %89 = vst [vmem:[%s266_s3 + $0x30] sm:$0xff] %v78_v32  ;;  %v62_v33 = vpop.f32.mrf.mxu0  ;;  %v68_v34 = vpop.f32.mrf.mxu1 }
  0xa9   :  { %v63_v35 = vadd.f32 %v143_v24, %v62_v33  ;;  %v69_v36 = vadd.f32 %v143_v24, %v68_v34 }
  0xab   :  { %84 = vst [vmem:[%s266_s3 + $0x8] sm:$0xff] %v63_v35 }
  0xac   :  { %86 = vst [vmem:[%s266_s3 + $0x18] sm:$0xff] %v69_v36  ;;  %v74_v37 = vpop.f32.mrf.mxu2  ;;  %v80_v38 = vpop.f32.mrf.mxu3 }
  0xad   :  { %v75_v39 = vadd.f32 %v143_v24, %v74_v37  ;;  %v81_v40 = vadd.f32 %v143_v24, %v80_v38 }
  0xaf   :  { %88 = vst [vmem:[%s266_s3 + $0x28] sm:$0xff] %v75_v39 }
  0xb0   :  { %90 = vst [vmem:[%s266_s3 + $0x38] sm:$0xff] %v81_v40 }

// kernel: gru_forward.3
= control target key start
LH: loop header
LB: loop body
LE: loop exit
PB: predicated region body
PF: predicated region fallthrough
CT: control target
= control target key end

     0   :  { %s2661_s1 = inlined_call_operand.vmem [shape: f32[128,384], index: 1, kind: input, shape index: {}]   ;;  %s2662_s3 = inlined_call_operand.vmem [shape: f32[128,384], index: 3, kind: input, shape index: {}]   ;;  %s2663_s0 = inlined_call_operand.vmem [shape: f32[64,128], index: 0, kind: input, shape index: {}]   ;;  %s2664_s5 = inlined_call_operand.vmem [shape: f32[8,128], index: 5, kind: input, shape index: {}]   ;;  %s2665_s4 = inlined_call_operand.vmem [shape: f32[1,128], index: 4, kind: input, shape index: {}]   ;;  %s2666_s2 = inlined_call_operand.vmem [shape: f32[1,384], index: 2, kind: input, shape index: {}]   ;;  %s2667_s6 = inlined_call_operand.vmem [shape: f32[8,8,128], index: 6, kind: output, shape index: {}]  }
   0x1   :  { %v82_v0 = vld [vmem:[%s2661_s1 + $0x168] sm:$0xff]  ;;  %v79_v2 = vld [vmem:[%s2661_s1 + $0x150] sm:$0xff]  ;;  %v76_v4 = vld [vmem:[%s2661_s1 + $0x138] sm:$0xff] }
   0x2   :  { %v1426_v1 = vld [vmem:[%s2662_s3 + $0x168] sm:$0xff]  ;;  %93 = vmatpush.msra.mxu0 %v82_v0  ;;  %v1435_v3 = vld [vmem:[%s2662_s3 + $0x150] sm:$0xff]  ;;  %v1443_v5 = vld [vmem:[%s2662_s3 + $0x138] sm:$0xff] }
   0x3   :  { %293 = vmatpush.msra.mxu3 %v1426_v1  ;;  %v73_v6 = vld [vmem:[%s2661_s1 + $0x120] sm:$0xff]  ;;  %v70_v8 = vld [vmem:[%s2661_s1 + $0x108] sm:$0xff]  ;;  %v67_v10 = vld [vmem:[%s2661_s1 + $0xf0] sm:$0xff] }
   0x4   :  { %94 = vmatpush.msra.mxu0 %v79_v2  ;;  %v1452_v7 = vld [vmem:[%s2662_s3 + $0x120] sm:$0xff]  ;;  %v1461_v9 = vld [vmem:[%s2662_s3 + $0x108] sm:$0xff]  ;;  %v1470_v11 = vld [vmem:[%s2662_s3 + $0xf0] sm:$0xff] }
   0x5   :  { %294 = vmatpush.msra.mxu3 %v1435_v3  ;;  %v64_v12 = vld [vmem:[%s2661_s1 + $0xd8] sm:$0xff]  ;;  %v61_v14 = vld [vmem:[%s2661_s1 + $0xc0] sm:$0xff]  ;;  %v83_v16 = vld [vmem:[%s2661_s1 + $0x170] sm:$0xff] }
   0x6   :  { %95 = vmatpush.msra.mxu0 %v76_v4  ;;  %v1479_v13 = vld [vmem:[%s2662_s3 + $0xd8] sm:$0xff]  ;;  %v1488_v15 = vld [vmem:[%s2662_s3 + $0xc0] sm:$0xff]  ;;  %v58_v18 = vld [vmem:[%s2661_s1 + $0xa8] sm:$0xff]  ;;  %134 = vmatpush.msra.mxu1 %v83_v16 }
   0x7   :  { %295 = vmatpush.msra.mxu3 %v1443_v5  ;;  %v80_v17 = vld [vmem:[%s2661_s1 + $0x158] sm:$0xff]  ;;  %v1503_v19 = vld [vmem:[%s2662_s3 + $0xa8] sm:$0xff]  ;;  %v77_v20 = vld [vmem:[%s2661_s1 + $0x140] sm:$0xff] }
   0x8   :  { %96 = vmatpush.msra.mxu0 %v73_v6  ;;  %v55_v21 = vld [vmem:[%s2661_s1 + $0x90] sm:$0xff]  ;;  %135 = vmatpush.msra.mxu1 %v80_v17  ;;  %v74_v23 = vld [vmem:[%s2661_s1 + $0x128] sm:$0xff]  ;;  %v52_v24 = vld [vmem:[%s2661_s1 + $0x78] sm:$0xff] }
   0x9   :  { %296 = vmatpush.msra.mxu3 %v1452_v7  ;;  %v1515_v22 = vld [vmem:[%s2662_s3 + $0x90] sm:$0xff]  ;;  %v1527_v25 = vld [vmem:[%s2662_s3 + $0x78] sm:$0xff]  ;;  %v49_v27 = vld [vmem:[%s2661_s1 + $0x60] sm:$0xff] }
   0xa   :  { %97 = vmatpush.msra.mxu0 %v70_v8  ;;  %136 = vmatpush.msra.mxu1 %v77_v20  ;;  %v71_v26 = vld [vmem:[%s2661_s1 + $0x110] sm:$0xff]  ;;  %v1539_v28 = vld [vmem:[%s2662_s3 + $0x60] sm:$0xff]  ;;  %v68_v29 = vld [vmem:[%s2661_s1 + $0xf8] sm:$0xff] }
   0xb   :  { %297 = vmatpush.msra.mxu3 %v1461_v9  ;;  %v46_v30 = vld [vmem:[%s2661_s1 + $0x48] sm:$0xff]  ;;  %v65_v32 = vld [vmem:[%s2661_s1 + $0xe0] sm:$0xff]  ;;  %v43_v33 = vld [vmem:[%s2661_s1 + $0x30] sm:$0xff] }
   0xc   :  { %98 = vmatpush.msra.mxu0 %v67_v10  ;;  %137 = vmatpush.msra.mxu1 %v74_v23  ;;  %v1551_v31 = vld [vmem:[%s2662_s3 + $0x48] sm:$0xff]  ;;  %v1563_v34 = vld [vmem:[%s2662_s3 + $0x30] sm:$0xff]  ;;  %v40_v36 = vld [vmem:[%s2661_s1 + $0x18] sm:$0xff] }
   0xd   :  { %298 = vmatpush.msra.mxu3 %v1470_v11  ;;  %2695 = vst [vmem:[#allocation4_spill] sm:$0xff] %v1563_v34  ;;  %v62_v35 = vld [vmem:[%s2661_s1 + $0xc8] sm:$0xff]  ;;  %v1575_v37 = vld [vmem:[%s2662_s3 + $0x18] sm:$0xff]  ;;  %v59_v38 = vld [vmem:[%s2661_s1 + $0xb0] sm:$0xff] }
   0xe   :  { %99 = vmatpush.msra.mxu0 %v64_v12  ;;  %138 = vmatpush.msra.mxu1 %v71_v26  ;;  %2696 = vst [vmem:[#allocation5_spill] sm:$0xff] %v1575_v37  ;;  %v37_v39 = vld [vmem:[%s2661_s1] sm:$0xff]  ;;  %v84_v43 = vld [vmem:[%s2661_s1 + $0x178] sm:$0xff]  ;;  %v1606_v44 = vld [vmem:[%s2662_s3 + $0x170] sm:$0xff] }
   0xf   :  { %299 = vmatpush.msra.mxu3 %v1479_v13  ;;  %v1587_v40 = vld [vmem:[%s2662_s3] sm:$0xff]  ;;  %v1611_v45 = vld [vmem:[%s2662_s3 + $0x178] sm:$0xff]  ;;  %175 = vmatpush.msra.mxu2 %v84_v43  ;;  %v78_v51 = vld [vmem:[%s2661_s1 + $0x148] sm:$0xff] }
  0x10   :  { %100 = vmatpush.msra.mxu0 %v61_v14  ;;  %139 = vmatpush.msra.mxu1 %v68_v29  ;;  %2697 = vst [vmem:[#allocation6_spill] sm:$0xff] %v1587_v40  ;;  %v1593_v41 = vld [vmem:[%s2663_s0] sm:$0xff]  ;;  %v56_v46 = vld [vmem:[%s2661_s1 + $0x98] sm:$0xff]  ;;  %v1648_v53 = vld [vmem:[%s2662_s3 + $0x148] sm:$0xff] }
  0x11   :  { %300 = vmatpush.msra.mxu3 %v1488_v15  ;;  %v1598_v42 = vld [vmem:[%s2664_s5] sm:$0xff]  ;;  %v1625_v48 = vld [vmem:[%s2662_s3 + $0x158] sm:$0xff]  ;;  %v50_v54 = vld [vmem:[%s2661_s1 + $0x68] sm:$0xff] }
  0x12   :  { %101 = vmatpush.msra.mxu0 %v58_v18  ;;  %140 = vmatpush.msra.mxu1 %v65_v32  ;;  %v81_v47 = vld [vmem:[%s2661_s1 + $0x160] sm:$0xff]  ;;  %v75_v55 = vld [vmem:[%s2661_s1 + $0x130] sm:$0xff]  ;;  %v1661_v56 = vld [vmem:[%s2662_s3 + $0x128] sm:$0xff] }
  0x13   :  { %301 = vmatpush.msra.mxu3 %v1503_v19  ;;  %v1630_v49 = vld [vmem:[%s2662_s3 + $0x160] sm:$0xff]  ;;  %176 = vmatpush.msra.mxu2 %v81_v47  ;;  %v1666_v57 = vld [vmem:[%s2662_s3 + $0x130] sm:$0xff]  ;;  %v1672_v58 = vld [vmem:[%s2663_s0 + $0x8] sm:$0xff] }
  0x14   :  { %102 = vmatpush.msra.mxu0 %v55_v21  ;;  %141 = vmatpush.msra.mxu1 %v62_v35  ;;  %v53_v50 = vld [vmem:[%s2661_s1 + $0x80] sm:$0xff]  ;;  %v47_v59 = vld [vmem:[%s2661_s1 + $0x50] sm:$0xff]  ;;  %v1686_v61 = vld [vmem:[%s2662_s3 + $0x118] sm:$0xff] }
  0x15   :  { %302 = vmatpush.msra.mxu3 %v1515_v22  ;;  %v1643_v52 = vld [vmem:[%s2662_s3 + $0x140] sm:$0xff]  ;;  %177 = vmatpush.msra.mxu2 %v78_v51  ;;  %v1681_v60 = vld [vmem:[%s2662_s3 + $0x110] sm:$0xff]  ;;  %v44_v62 = vld [vmem:[%s2661_s1 + $0x38] sm:$0xff] }
  0x16   :  { %103 = vmatpush.msra.mxu0 %v52_v24  ;;  %142 = vmatpush.msra.mxu1 %v59_v38  ;;  %v72_v63 = vld [vmem:[%s2661_s1 + $0x118] sm:$0xff]  ;;  %v1705_v2 = vld [vmem:[%s2662_s3 + $0x100] sm:$0xff]  ;;  %v1723_v10 = vld [vmem:[%s2662_s3 + $0xe8] sm:$0xff] }
  0x17   :  { %303 = vmatpush.msra.mxu3 %v1527_v25  ;;  %178 = vmatpush.msra.mxu2 %v75_v55  ;;  %v1700_v0 = vld [vmem:[%s2662_s3 + $0xf8] sm:$0xff]  ;;  %v41_v4 = vld [vmem:[%s2661_s1 + $0x20] sm:$0xff]  ;;  %v38_v12 = vld [vmem:[%s2661_s1 + $0x8] sm:$0xff] }
  0x18   :  { %104 = vmatpush.msra.mxu0 %v49_v27  ;;  %143 = vmatpush.msra.mxu1 %v56_v46  ;;  %v69_v6 = vld [vmem:[%s2661_s1 + $0x100] sm:$0xff]  ;;  %v66_v14 = vld [vmem:[%s2661_s1 + $0xe8] sm:$0xff]  ;;  %v1741_v17 = vld [vmem:[%s2662_s3 + $0xd0] sm:$0xff] }
  0x19   :  { %304 = vmatpush.msra.mxu3 %v1539_v28  ;;  %v1718_v8 = vld [vmem:[%s2662_s3 + $0xe0] sm:$0xff]  ;;  %179 = vmatpush.msra.mxu2 %v72_v63  ;;  %v1736_v16 = vld [vmem:[%s2662_s3 + $0xc8] sm:$0xff]  ;;  %v1747_v18 = vld [vmem:[%s2663_s0 + $0x10] sm:$0xff] }
  0x1a   :  { %105 = vmatpush.msra.mxu0 %v46_v30  ;;  %144 = vmatpush.msra.mxu1 %v53_v50  ;;  %v1753_v20 = vld [vmem:[%s2662_s3 + $0xb0] sm:$0xff]  ;;  %v1758_v21 = vld [vmem:[%s2662_s3 + $0xb8] sm:$0xff]  ;;  %v1775_v26 = vld [vmem:[%s2662_s3 + $0xa0] sm:$0xff] }
  0x1b   :  { %305 = vmatpush.msra.mxu3 %v1551_v31  ;;  %180 = vmatpush.msra.mxu2 %v69_v6  ;;  %v63_v23 = vld [vmem:[%s2661_s1 + $0xd0] sm:$0xff]  ;;  %v1769_v24 = vld [vmem:[%s2662_s3 + $0x98] sm:$0xff]  ;;  %v1785_v29 = vld [vmem:[%s2662_s3 + $0x80] sm:$0xff] }
  0x1c   :  { %106 = vmatpush.msra.mxu0 %v43_v33  ;;  %145 = vmatpush.msra.mxu1 %v50_v54  ;;  %v60_v27 = vld [vmem:[%s2661_s1 + $0xb8] sm:$0xff]  ;;  %v1790_v30 = vld [vmem:[%s2662_s3 + $0x88] sm:$0xff]  ;;  %v57_v32 = vld [vmem:[%s2661_s1 + $0xa0] sm:$0xff] }
  0x1d   :  { %306 = vmatpush.msra.mxu3 %v1563_v34  ;;  %181 = vmatpush.msra.mxu2 %v66_v14  ;;  %v1801_v33 = vld [vmem:[%s2662_s3 + $0x68] sm:$0xff]  ;;  %v1806_v35 = vld [vmem:[%s2662_s3 + $0x70] sm:$0xff]  ;;  %v1827_v43 = vld [vmem:[%s2662_s3 + $0x58] sm:$0xff] }
  0x1e   :  { %107 = vmatpush.msra.mxu0 %v40_v36  ;;  %146 = vmatpush.msra.mxu1 %v47_v59  ;;  %v1813_v36 = vld [vmem:[%s2663_s0 + $0x18] sm:$0xff]  ;;  %v54_v38 = vld [vmem:[%s2661_s1 + $0x88] sm:$0xff]  ;;  %v51_v46 = vld [vmem:[%s2661_s1 + $0x70] sm:$0xff] }
  0x1f   :  { %307 = vmatpush.msra.mxu3 %v1575_v37  ;;  %182 = vmatpush.msra.mxu2 %v63_v23  ;;  %v1839_v47 = vld [vmem:[%s2662_s3 + $0x38] sm:$0xff]  ;;  %v1844_v50 = vld [vmem:[%s2662_s3 + $0x40] sm:$0xff]  ;;  %v1859_v55 = vld [vmem:[%s2662_s3 + $0x28] sm:$0xff] }
  0x20   :  { %108 = vmatpush.msra.mxu0 %v37_v39  ;;  %147 = vmatpush.msra.mxu1 %v44_v62  ;;  %v1822_v39 = vld [vmem:[%s2662_s3 + $0x50] sm:$0xff]  ;;  %2698 = vst [vmem:[#allocation7_spill] sm:$0xff] %v1839_v47  ;;  %v48_v51 = vld [vmem:[%s2661_s1 + $0x58] sm:$0xff]  ;;  %v1854_v54 = vld [vmem:[%s2662_s3 + $0x20] sm:$0xff] }
  0x21   :  { %308 = vmatpush.msra.mxu3 %v1587_v40  ;;  %109 = vmatmul.f32.vlgmr.msra.gmra.mxu0 %v1593_v41  ;;  %2699 = vst [vmem:[#allocation8_spill] sm:$0xff] %v1854_v54  ;;  %v45_v59 = vld [vmem:[%s2661_s1 + $0x40] sm:$0xff]  ;;  %v1870_v62 = vld [vmem:[%s2662_s3 + $0x8] sm:$0xff]  ;;  %v1875_v63 = vld [vmem:[%s2662_s3 + $0x10] sm:$0xff] }
  0x22   :  { %309 = vmatmul.f32.vlgmr.msra.gmra.mxu3 %v1598_v42  ;;  %333 = vmatpush.msrb.mxu0 %v1611_v45  ;;  %2700 = vst [vmem:[#allocation9_spill] sm:$0xff] %v1859_v55  ;;  %v42_v6 = vld [vmem:[%s2661_s1 + $0x28] sm:$0xff]  ;;  %v85_v23 = vld [vmem:[%s2666_s2] sm:$0x7] }
  0x23   :  { %313 = vmatpush.msrb.mxu3 %v1606_v44  ;;  %148 = vmatpush.msra.mxu1 %v41_v4  ;;  %2701 = vst [vmem:[#allocation10_spill] sm:$0xff] %v1870_v62  ;;  %v1882_v4 = vld [vmem:[%s2663_s0 + $0x20] sm:$0xff]  ;;  %v1905_v14 = vld [vmem:[%s2663_s0 + $0x28] sm:$0xff] }
  0x24   :  { %334 = vmatpush.msrb.mxu0 %v1630_v49  ;;  %183 = vmatpush.msra.mxu2 %v60_v27  ;;  %2702 = vst [vmem:[#allocation11_spill] sm:$0xff] %v1875_v63  ;;  %v87_v27 = vperm.slane %v85_v23, 0 }
  0x25   :  { %314 = vmatpush.msrb.mxu3 %v1625_v48  ;;  %149 = vmatpush.msra.mxu1 %v38_v12  ;;  %v39_v12 = vld [vmem:[%s2661_s1 + $0x10] sm:$0xff] }
  0x26   :  { %335 = vmatpush.msrb.mxu0 %v1648_v53  ;;  %150 = vmatmul.f32.vlgmr.msra.gmra.mxu1 %v1593_v41 }
  0x27   :  { %315 = vmatpush.msrb.mxu3 %v1643_v52  ;;  %408 = vmatpush.msrb.mxu1 %v1426_v1 }
  0x28   :  { %336 = vmatpush.msrb.mxu0 %v1666_v57  ;;  %184 = vmatpush.msra.mxu2 %v57_v32 }
  0x29   :  { %316 = vmatpush.msrb.mxu3 %v1661_v56  ;;  %112 = vmatmul.f32.gmra.mxu0 %v1672_v58 }
  0x2a   :  { %337 = vmatpush.msrb.mxu0 %v1686_v61  ;;  %409 = vmatpush.msrb.mxu1 %v1435_v3 }
  0x2b   :  { %317 = vmatpush.msrb.mxu3 %v1681_v60  ;;  %185 = vmatpush.msra.mxu2 %v54_v38 }
  0x2c   :  { %338 = vmatpush.msrb.mxu0 %v1705_v2  ;;  %410 = vmatpush.msrb.mxu1 %v1443_v5 }
  0x2d   :  { %318 = vmatpush.msrb.mxu3 %v1700_v0  ;;  %186 = vmatpush.msra.mxu2 %v51_v46 }
  0x2e   :  { %339 = vmatpush.msrb.mxu0 %v1723_v10  ;;  %153 = vmatmul.f32.gmra.mxu1 %v1672_v58 }
  0x2f   :  { %319 = vmatpush.msrb.mxu3 %v1718_v8  ;;  %187 = vmatpush.msra.mxu2 %v48_v51 }
  0x30   :  { %340 = vmatpush.msrb.mxu0 %v1741_v17  ;;  %411 = vmatpush.msrb.mxu1 %v1452_v7 }
  0x31   :  { %320 = vmatpush.msrb.mxu3 %v1736_v16  ;;  %115 = vmatmul.f32.gmra.mxu0 %v1747_v18 }
  0x32   :  { %341 = vmatpush.msrb.mxu0 %v1758_v21  ;;  %188 = vmatpush.msra.mxu2 %v45_v59 }
  0x33   :  { %321 = vmatpush.msrb.mxu3 %v1753_v20  ;;  %412 = vmatpush.msrb.mxu1 %v1461_v9 }
  0x34   :  { %342 = vmatpush.msrb.mxu0 %v1775_v26  ;;  %189 = vmatpush.msra.mxu2 %v42_v6 }
  0x35   :  { %322 = vmatpush.msrb.mxu3 %v1769_v24  ;;  %413 = vmatpush.msrb.mxu1 %v1470_v11 }
  0x36   :  { %343 = vmatpush.msrb.mxu0 %v1790_v30  ;;  %156 = vmatmul.f32.gmra.mxu1 %v1747_v18 }
  0x37   :  { %323 = vmatpush.msrb.mxu3 %v1785_v29  ;;  %190 = vmatpush.msra.mxu2 %v39_v12 }
  0x38   :  { %344 = vmatpush.msrb.mxu0 %v1806_v35  ;;  %414 = vmatpush.msrb.mxu1 %v1479_v13 }
  0x39   :  { %324 = vmatpush.msrb.mxu3 %v1801_v33  ;;  %118 = vmatmul.f32.gmra.mxu0 %v1813_v36 }
  0x3a   :  { %345 = vmatpush.msrb.mxu0 %v1827_v43  ;;  %191 = vmatmul.f32.vlgmr.msra.gmra.mxu2 %v1593_v41  ;;  %v1926_v41 = vld [vmem:[%s2663_s0 + $0x30] sm:$0xff] }
  0x3b   :  { %325 = vmatpush.msrb.mxu3 %v1822_v39  ;;  %428 = vmatpush.msrb.mxu2 %v1606_v44 }
  0x3c   :  { %346 = vmatpush.msrb.mxu0 %v1844_v50  ;;  %415 = vmatpush.msrb.mxu1 %v1488_v15 }
  0x3d   :  { %326 = vmatpush.msrb.mxu3 %v1839_v47  ;;  %429 = vmatpush.msrb.mxu2 %v1625_v48 }
  0x3e   :  { %347 = vmatpush.msrb.mxu0 %v1859_v55  ;;  %416 = vmatpush.msrb.mxu1 %v1503_v19 }
  0x3f   :  { %327 = vmatpush.msrb.mxu3 %v1854_v54  ;;  %430 = vmatpush.msrb.mxu2 %v1643_v52 }
  0x40   :  { %348 = vmatpush.msrb.mxu0 %v1875_v63  ;;  %417 = vmatpush.msrb.mxu1 %v1515_v22 }
  0x41   :  { %328 = vmatpush.msrb.mxu3 %v1870_v62  ;;  %121 = vmatmul.f32.gmra.mxu0 %v1882_v4 }
  0x42   :  { %329 = vmatmul.f32.vlgmr.msrb.gmra.mxu3 %v1598_v42  ;;  %524 = vmatpush.msra.mxu0 %v1426_v1 }
  0x43   :  { %448 = vmatpush.msra.mxu3 %v1611_v45  ;;  %159 = vmatmul.f32.gmra.mxu1 %v1813_v36 }
  0x44   :  { %431 = vmatpush.msrb.mxu2 %v1661_v56  ;;  %418 = vmatpush.msrb.mxu1 %v1527_v25 }
  0x45   :  { %449 = vmatpush.msra.mxu3 %v1630_v49  ;;  %194 = vmatmul.f32.gmra.mxu2 %v1672_v58  ;;  %v1947_v58 = vld [vmem:[%s2663_s0 + $0x38] sm:$0xff] }
  0x46   :  { %432 = vmatpush.msrb.mxu2 %v1681_v60  ;;  %419 = vmatpush.msrb.mxu1 %v1539_v28 }
  0x47   :  { %450 = vmatpush.msra.mxu3 %v1648_v53  ;;  %525 = vmatpush.msra.mxu0 %v1435_v3 }
  0x48   :  { %433 = vmatpush.msrb.mxu2 %v1700_v0  ;;  %420 = vmatpush.msrb.mxu1 %v1551_v31 }
  0x49   :  { %124 = vmatmul.f32.gmra.mxu0 %v1905_v14  ;;  %451 = vmatpush.msra.mxu3 %v1666_v57 }
  0x4a   :  { %434 = vmatpush.msrb.mxu2 %v1718_v8  ;;  %421 = vmatpush.msrb.mxu1 %v1563_v34 }
  0x4b   :  { %452 = vmatpush.msra.mxu3 %v1686_v61  ;;  %162 = vmatmul.f32.gmra.mxu1 %v1882_v4 }
  0x4c   :  { %435 = vmatpush.msrb.mxu2 %v1736_v16  ;;  %422 = vmatpush.msrb.mxu1 %v1575_v37 }
  0x4d   :  { %453 = vmatpush.msra.mxu3 %v1705_v2  ;;  %197 = vmatmul.f32.gmra.mxu2 %v1747_v18 }
  0x4e   :  { %436 = vmatpush.msrb.mxu2 %v1753_v20  ;;  %423 = vmatpush.msrb.mxu1 %v1587_v40 }
  0x4f   :  { %454 = vmatpush.msra.mxu3 %v1723_v10  ;;  %526 = vmatpush.msra.mxu0 %v1443_v5 }
  0x50   :  { %544 = vmatpush.msra.mxu1 %v1606_v44  ;;  %437 = vmatpush.msrb.mxu2 %v1769_v24 }
  0x51   :  { %127 = vmatmul.f32.gmra.mxu0 %v1926_v41  ;;  %455 = vmatpush.msra.mxu3 %v1741_v17 }
  0x52   :  { %438 = vmatpush.msrb.mxu2 %v1785_v29  ;;  %545 = vmatpush.msra.mxu1 %v1625_v48 }
  0x53   :  { %456 = vmatpush.msra.mxu3 %v1758_v21  ;;  %165 = vmatmul.f32.gmra.mxu1 %v1905_v14 }
  0x54   :  { %439 = vmatpush.msrb.mxu2 %v1801_v33  ;;  %546 = vmatpush.msra.mxu1 %v1643_v52 }
  0x55   :  { %457 = vmatpush.msra.mxu3 %v1775_v26  ;;  %200 = vmatmul.f32.gmra.mxu2 %v1813_v36 }
  0x56   :  { %440 = vmatpush.msrb.mxu2 %v1822_v39  ;;  %527 = vmatpush.msra.mxu0 %v1452_v7 }
  0x57   :  { %458 = vmatpush.msra.mxu3 %v1790_v30  ;;  %547 = vmatpush.msra.mxu1 %v1661_v56 }
  0x58   :  { %441 = vmatpush.msrb.mxu2 %v1839_v47  ;;  %528 = vmatpush.msra.mxu0 %v1461_v9 }
  0x59   :  { %130 = vmatmul.f32.gmra.mxu0 %v1947_v58  ;;  %459 = vmatpush.msra.mxu3 %v1806_v35 }
  0x5a   :  { %442 = vmatpush.msrb.mxu2 %v1854_v54  ;;  %548 = vmatpush.msra.mxu1 %v1681_v60 }
  0x5b   :  { %460 = vmatpush.msra.mxu3 %v1827_v43  ;;  %168 = vmatmul.f32.gmra.mxu1 %v1926_v41 }
  0x5c   :  { %529 = vmatpush.msra.mxu0 %v1470_v11  ;;  %443 = vmatpush.msrb.mxu2 %v1870_v62 }
  0x5d   :  { %461 = vmatpush.msra.mxu3 %v1844_v50  ;;  %549 = vmatpush.msra.mxu1 %v1700_v0 }
  0x5e   :  { %203 = vmatmul.f32.gmra.mxu2 %v1882_v4  ;;  %530 = vmatpush.msra.mxu0 %v1479_v13 }
  0x5f   :  { %462 = vmatpush.msra.mxu3 %v1859_v55  ;;  %564 = vmatpush.msra.mxu2 %v1611_v45 }
  0x60   :  { %550 = vmatpush.msra.mxu1 %v1718_v8  ;;  %531 = vmatpush.msra.mxu0 %v1488_v15 }
  0x61   :  { %349 = vmatmul.f32.vlgmr.msrb.gmra.mxu0 %v1598_v42  ;;  %463 = vmatpush.msra.mxu3 %v1875_v63 }
  0x62   :  { %565 = vmatpush.msra.mxu2 %v1630_v49  ;;  %551 = vmatpush.msra.mxu1 %v1736_v16 }
  0x63   :  { %640 = vmatpush.msrb.mxu3 %v1426_v1  ;;  %532 = vmatpush.msra.mxu0 %v1503_v19 }
  0x64   :  { %566 = vmatpush.msra.mxu2 %v1648_v53  ;;  %552 = vmatpush.msra.mxu1 %v1753_v20 }
  0x65   :  { %641 = vmatpush.msrb.mxu3 %v1435_v3  ;;  %171 = vmatmul.f32.gmra.mxu1 %v1947_v58 }
  0x66   :  { %533 = vmatpush.msra.mxu0 %v1515_v22  ;;  %567 = vmatpush.msra.mxu2 %v1666_v57 }
  0x67   :  { %553 = vmatpush.msra.mxu1 %v1769_v24  ;;  %206 = vmatmul.f32.gmra.mxu2 %v1905_v14 }
  0x68   :  { %534 = vmatpush.msra.mxu0 %v1527_v25  ;;  %568 = vmatpush.msra.mxu2 %v1686_v61 }
  0x69   :  { %554 = vmatpush.msra.mxu1 %v1785_v29  ;;  %642 = vmatpush.msrb.mxu3 %v1443_v5 }
  0x6a   :  { %535 = vmatpush.msra.mxu0 %v1539_v28  ;;  %569 = vmatpush.msra.mxu2 %v1705_v2 }
  0x6b   :  { %555 = vmatpush.msra.mxu1 %v1801_v33  ;;  %643 = vmatpush.msrb.mxu3 %v1452_v7 }
  0x6c   :  { %536 = vmatpush.msra.mxu0 %v1551_v31  ;;  %570 = vmatpush.msra.mxu2 %v1723_v10 }
  0x6d   :  { %556 = vmatpush.msra.mxu1 %v1822_v39  ;;  %644 = vmatpush.msrb.mxu3 %v1461_v9 }
  0x6e   :  { %537 = vmatpush.msra.mxu0 %v1563_v34  ;;  %571 = vmatpush.msra.mxu2 %v1741_v17 }
  0x6f   :  { %557 = vmatpush.msra.mxu1 %v1839_v47  ;;  %209 = vmatmul.f32.gmra.mxu2 %v1926_v41 }
  0x70   :  { %538 = vmatpush.msra.mxu0 %v1575_v37  ;;  %572 = vmatpush.msra.mxu2 %v1758_v21 }
  0x71   :  { %558 = vmatpush.msra.mxu1 %v1854_v54  ;;  %645 = vmatpush.msrb.mxu3 %v1470_v11 }
  0x72   :  { %539 = vmatpush.msra.mxu0 %v1587_v40  ;;  %573 = vmatpush.msra.mxu2 %v1775_v26 }
  0x73   :  { %559 = vmatpush.msra.mxu1 %v1870_v62  ;;  %646 = vmatpush.msrb.mxu3 %v1479_v13 }
  0x74   :  { %660 = vmatpush.msrb.mxu0 %v1606_v44  ;;  %574 = vmatpush.msra.mxu2 %v1790_v30 }
  0x75   :  { %647 = vmatpush.msrb.mxu3 %v1488_v15 }
  0x76   :  { %661 = vmatpush.msrb.mxu0 %v1625_v48  ;;  %575 = vmatpush.msra.mxu2 %v1806_v35 }
  0x77   :  { %212 = vmatmul.f32.gmra.mxu2 %v1947_v58  ;;  %648 = vmatpush.msrb.mxu3 %v1503_v19  ;;  %v2061_v58 = vperm.slane %v85_v23, 1 }
  0x78   :  { %662 = vmatpush.msrb.mxu0 %v1643_v52  ;;  %576 = vmatpush.msra.mxu2 %v1827_v43 }
  0x79   :  { %649 = vmatpush.msrb.mxu3 %v1515_v22  ;;  %2706 = vst [vmem:[#allocation15_spill] sm:$0xff] %v2061_v58 }
  0x7a   :  { %663 = vmatpush.msrb.mxu0 %v1661_v56  ;;  %577 = vmatpush.msra.mxu2 %v1844_v50 }
  0x7b   :  { %650 = vmatpush.msrb.mxu3 %v1527_v25 }
  0x7c   :  { %664 = vmatpush.msrb.mxu0 %v1681_v60  ;;  %578 = vmatpush.msra.mxu2 %v1859_v55 }
  0x7d   :  { %651 = vmatpush.msrb.mxu3 %v1539_v28 }
  0x7e   :  { %665 = vmatpush.msrb.mxu0 %v1700_v0  ;;  %579 = vmatpush.msra.mxu2 %v1875_v63 }
  0x7f   :  { %652 = vmatpush.msrb.mxu3 %v1551_v31 }
  0x80   :  { %666 = vmatpush.msrb.mxu0 %v1718_v8 }
  0x81   :  { %653 = vmatpush.msrb.mxu3 %v1563_v34 }
  0x82   :  { %667 = vmatpush.msrb.mxu0 %v1736_v16 }
  0x83   :  { %654 = vmatpush.msrb.mxu3 %v1575_v37 }
  0x84   :  { %668 = vmatpush.msrb.mxu0 %v1753_v20 }
  0x85   :  { %655 = vmatpush.msrb.mxu3 %v1587_v40 }
  0x86   :  { %669 = vmatpush.msrb.mxu0 %v1769_v24 }
  0x88   :  { %670 = vmatpush.msrb.mxu0 %v1785_v29 }
  0x8a   :  { %671 = vmatpush.msrb.mxu0 %v1801_v33 }
  0x8c   :  { %672 = vmatpush.msrb.mxu0 %v1822_v39 }
  0x8e   :  { %673 = vmatpush.msrb.mxu0 %v1839_v47 }
  0x90   :  { %674 = vmatpush.msrb.mxu0 %v1854_v54 }
  0x92   :  { %675 = vmatpush.msrb.mxu0 %v1870_v62 }
  0x9e   :  { %v110_v18 = vpop.f32.mrf.mxu0 }
  0x9f   :  { %v111_v46 = vadd.f32 %v110_v18, %v87_v27 }
  0xa3   :  { %v151_v40 = vpop.f32.mrf.mxu1 }
  0xa5   :  { %v310_v38 = vpop.f32.mrf.mxu3 }
  0xa6   :  { %v113_v32 = vpop.f32.mrf.mxu0  ;;  %v359_v59 = vadd.f32 %v310_v38, %v111_v46 }
  0xa7   :  { %v2055_v36 = vadd.f32 %v113_v32, %v87_v27 }
  0xa8   :  { %v1232_v6 = vmul.f32 -1.442695, %v359_v59 }
  0xa9   :  { %2703 = vst [vmem:[#allocation12_spill] sm:$0xff] %v2055_v36  ;;  %v152_v36 = vadd.f32 %v151_v40, %v2061_v58 }
  0xaa   :  { %1256 = vpow2.f32 %v1232_v6 }
  0xae   :  { %v116_v51 = vpop.f32.mrf.mxu0 }
  0xaf   :  { %v2057_v4 = vadd.f32 %v116_v51, %v87_v27 }
  0xb0   :  { %v1257_v41 = vpop.eup %1256 }
  0xb1   :  { %2704 = vst [vmem:[#allocation13_spill] sm:$0xff] %v2057_v4  ;;  %v363_v32 = vadd.f32 1.0, %v1257_v41  ;;  %v2070_v41 = vperm.slane %v85_v23, 2 }
  0xb3   :  { %1258 = vrcp.f32 %v363_v32  ;;  %2710 = vst [vmem:[#allocation19_spill] sm:$0xff] %v2070_v41  ;;  %vm369_vm1 = vweird.f32 %v363_v32 }
  0xb6   :  { %v119_v12 = vpop.f32.mrf.mxu0 }
  0xb7   :  { %v2059_v14 = vadd.f32 %v119_v12, %v87_v27 }
  0xb9   :  { %2705 = vst [vmem:[#allocation14_spill] sm:$0xff] %v2059_v14  ;;  %v1259_v12 = vpop.eup %1258 }
  0xba   :  { %v365_v14 = vmul.f32 %v1259_v12, %v363_v32  ;;  %vm370_vm0 = vweird.f32 %v1259_v12 }
  0xbb   :  { %vm371_vm2 = vmor %vm369_vm1, %vm370_vm0 }
  0xbd   :  { %v192_v6 = vpop.f32.mrf.mxu2 }
  0xbe   :  { %v122_v62 = vpop.f32.mrf.mxu0 }
  0xbf   :  { %v2063_v63 = vadd.f32 %v122_v62, %v87_v27 }
  0xc1   :  { %2707 = vst [vmem:[#allocation16_spill] sm:$0xff] %v2063_v63  ;;  %v366_v63 = vsub.f32 1.0, %v365_v14  ;;  %v2083_v14 = vld [vmem:[%s2665_s4] ss:$0 sm:$0xff] }
  0xc5   :  { %v330_v18 = vpop.f32.mrf.mxu3 }
  0xc6   :  { %v379_v38 = vadd.f32 %v330_v18, %v152_v36  ;;  %v125_v46 = vpop.f32.mrf.mxu0  ;;  %v367_v18 = vmul.f32 %v1259_v12, %v366_v63  ;;  %v373_v63 = vand.u32 2147483647, %v363_v32 }
  0xc7   :  { %v2066_v59 = vadd.f32 %v125_v46, %v87_v27 }
  0xc8   :  { %v1233_v51 = vmul.f32 -1.442695, %v379_v38  ;;  %v195_v40 = vpop.f32.mrf.mxu2  ;;  %v368_v58 = vadd.f32 %v1259_v12, %v367_v18  ;;  %vm374_vm3 = vcmp.eq.f32.partialorder %v373_v63, 8.507059e+37 }
  0xc9   :  { %2708 = vst [vmem:[#allocation17_spill] sm:$0xff] %v2066_v59  ;;  %v2073_v36 = vadd.f32 %v195_v40, %v2070_v41 }
  0xca   :  { %1260 = vpow2.f32 %v1233_v51  ;;  %v372_v40 = vsel %vm371_vm2, %v1259_v12, %v368_v58 }
  0xcb   :  { %2711 = vst [vmem:[#allocation20_spill] sm:$0xff] %v2073_v36 }
  0xce   :  { %v128_v4 = vpop.f32.mrf.mxu0 }
  0xcf   :  { %v2068_v37 = vadd.f32 %v128_v4, %v87_v27  ;;  %v375_v4 = vand.u32 2147483648, %v363_v32 }
  0xd0   :  { %v1261_v54 = vpop.eup %1260  ;;  %v198_v55 = vpop.f32.mrf.mxu2 }
  0xd1   :  { %2709 = vst [vmem:[#allocation18_spill] sm:$0xff] %v2068_v37  ;;  %v383_v62 = vadd.f32 1.0, %v1261_v54  ;;  %v2078_v54 = vadd.f32 %v198_v55, %v2070_v41  ;;  %v193_v37 = vadd.f32 %v192_v6, %v2070_v41 }
  0xd3   :  { %1262 = vrcp.f32 %v383_v62  ;;  %2713 = vst [vmem:[#allocation22_spill] sm:$0xff] %v2078_v54  ;;  %vm389_vm4 = vweird.f32 %v383_v62  ;;  %v395_v54 = vand.u32 2147483648, %v383_v62  ;;  %v393_v34 = vand.u32 2147483647, %v383_v62 }
  0xd5   :  { %vm394_vm7 = vcmp.eq.f32.partialorder %v393_v34, 8.507059e+37 }
  0xd6   :  { %v131_v38 = vpop.f32.mrf.mxu0 }
  0xd7   :  { %v2075_v46 = vadd.f32 %v131_v38, %v87_v27 }
  0xd8   :  { %v201_v47 = vpop.f32.mrf.mxu2 }
  0xd9   :  { %2712 = vst [vmem:[#allocation21_spill] sm:$0xff] %v2075_v46  ;;  %v1263_v51 = vpop.eup %1262  ;;  %v376_v46 = vor.u32 1.1754944e-38, %v375_v4  ;;  %v2088_v32 = vadd.f32 %v201_v47, %v2070_v41  ;;  %v396_v4 = vor.u32 1.1754944e-38, %v395_v54 }
  0xda   :  { %v385_v59 = vmul.f32 %v1263_v51, %v383_v62  ;;  %vm390_vm5 = vweird.f32 %v1263_v51 }
  0xdb   :  { %v377_v55 = vsel %vm374_vm3, %v376_v46, %v372_v40  ;;  %vm391_vm6 = vmor %vm389_vm4, %vm390_vm5 }
  0xdc   :  { %v386_v23 = vsub.f32 1.0, %v385_v59 }
  0xde   :  { %v387_v27 = vmul.f32 %v1263_v51, %v386_v23  ;;  %v350_v38 = vpop.f32.mrf.mxu0 }
  0xdf   :  { %v399_v18 = vadd.f32 %v2083_v14, %v350_v38 }
  0xe0   :  { %v388_v59 = vadd.f32 %v1263_v51, %v387_v27 }
  0xe1   :  { %v400_v36 = vmul.f32 %v399_v18, %v377_v55  ;;  %v204_v63 = vpop.f32.mrf.mxu2  ;;  %v2730_v55 = vld [vmem:[#allocation12_spill] sm:$0xff] }
  0xe2   :  { %v392_v12 = vsel %vm391_vm6, %v1263_v51, %v388_v59  ;;  %v2091_v38 = vadd.f32 %v204_v63, %v2070_v41 }
  0xe3   :  { %v401_v58 = vadd.f32 %v400_v36, %v193_v37  ;;  %v397_v23 = vsel %vm394_vm7, %v396_v4, %v392_v12  ;;  %v2731_v12 = vld [vmem:[#allocation15_spill] sm:$0xff] }
  0xe4   :  { %v403_v6 = vsub.f32 1.0, %v397_v23  ;;  %2714 = vst [vmem:[#allocation23_spill] sm:$0xff] %v2091_v38  ;;  %v405_v40 = vmul.f32 %v397_v23, %v1598_v42 }
  0xe5   :  { %1264 = vtanh.f32 %v401_v58 }
  0xea   :  { %v207_v34 = vpop.f32.mrf.mxu2 }
  0xeb   :  { %v1265_v46 = vpop.eup %1264  ;;  %v2105_v37 = vadd.f32 %v207_v34, %v2070_v41 }
  0xec   :  { %v404_v27 = vmul.f32 %v1265_v46, %v403_v6 }
  0xed   :  { %2715 = vst [vmem:[#allocation24_spill] sm:$0xff] %v2105_v37 }
  0xee   :  { %v2094_v62 = vadd.f32 %v405_v40, %v404_v27 }
  0xf0   :  { %407 = vst [vmem:[%s2667_s6] sm:$0xff] %v2094_v62  ;;  %424 = vmatmul.f32.vlgmr.msrb.gmra.mxu1 %v2094_v62  ;;  %444 = vmatmul.f32.vlgmr.msrb.gmra.mxu2 %v2094_v62 }
  0xf1   :  { %464 = vmatmul.f32.vlgmr.msra.gmra.mxu3 %v2094_v62  ;;  %680 = vmatpush.msrb.mxu1 %v1611_v45 }
  0xf2   :  { %756 = vmatpush.msrb.mxu2 %v1426_v1  ;;  %776 = vmatpush.msra.mxu3 %v1606_v44  ;;  %v210_v1 = vpop.f32.mrf.mxu2 }
  0xf3   :  { %681 = vmatpush.msrb.mxu1 %v1630_v49  ;;  %v2120_v42 = vadd.f32 %v210_v1, %v2070_v41 }
  0xf4   :  { %757 = vmatpush.msrb.mxu2 %v1435_v3  ;;  %777 = vmatpush.msra.mxu3 %v1625_v48  ;;  %v2717_v3 = vld [vmem:[#allocation4_spill] sm:$0xff] }
  0xf5   :  { %682 = vmatpush.msrb.mxu1 %v1648_v53  ;;  %2716 = vst [vmem:[#allocation25_spill] sm:$0xff] %v2120_v42  ;;  %v2732_v42 = vld [vmem:[#allocation20_spill] sm:$0xff] }
  0xf6   :  { %758 = vmatpush.msrb.mxu2 %v1443_v5  ;;  %778 = vmatpush.msra.mxu3 %v1643_v52  ;;  %v2718_v5 = vld [vmem:[#allocation7_spill] sm:$0xff] }
  0xf7   :  { %683 = vmatpush.msrb.mxu1 %v1666_v57 }
  0xf8   :  { %759 = vmatpush.msrb.mxu2 %v1452_v7  ;;  %779 = vmatpush.msra.mxu3 %v1661_v56  ;;  %v2719_v7 = vld [vmem:[#allocation9_spill] sm:$0xff] }
  0xf9   :  { %684 = vmatpush.msrb.mxu1 %v1686_v61 }
  0xfa   :  { %760 = vmatpush.msrb.mxu2 %v1461_v9  ;;  %780 = vmatpush.msra.mxu3 %v1681_v60  ;;  %v2720_v9 = vld [vmem:[#allocation5_spill] sm:$0xff]  ;;  %v2169_v54 = vpop.f32.mrf.mxu2 }
  0xfb   :  { %685 = vmatpush.msrb.mxu1 %v1705_v2 }
  0xfc   :  { %761 = vmatpush.msrb.mxu2 %v1470_v11  ;;  %781 = vmatpush.msra.mxu3 %v1700_v0  ;;  %v2721_v11 = vld [vmem:[#allocation8_spill] sm:$0xff] }
  0xfd   :  { %686 = vmatpush.msrb.mxu1 %v1723_v10  ;;  %2729 = vst [vmem:[#allocation8_spill] sm:$0xff] %v2169_v54 }
  0xfe   :  { %762 = vmatpush.msrb.mxu2 %v1479_v13  ;;  %782 = vmatpush.msra.mxu3 %v1718_v8  ;;  %v2722_v13 = vld [vmem:[#allocation11_spill] sm:$0xff] }
  0xff   :  { %687 = vmatpush.msrb.mxu1 %v1741_v17 }
 0x100   :  { %763 = vmatpush.msrb.mxu2 %v1488_v15  ;;  %783 = vmatpush.msra.mxu3 %v1736_v16  ;;  %v2723_v15 = vld [vmem:[#allocation6_spill] sm:$0xff] }
 0x101   :  { %688 = vmatpush.msrb.mxu1 %v1758_v21 }
 0x102   :  { %764 = vmatpush.msrb.mxu2 %v1503_v19  ;;  %784 = vmatpush.msra.mxu3 %v1753_v20  ;;  %v2724_v19 = vld [vmem:[#allocation10_spill] sm:$0xff] }
 0x103   :  { %689 = vmatpush.msrb.mxu1 %v1775_v26 }
 0x104   :  { %765 = vmatpush.msrb.mxu2 %v1515_v22  ;;  %785 = vmatpush.msra.mxu3 %v1769_v24  ;;  %v154_v22 = vpop.f32.mrf.mxu1 }
 0x105   :  { %690 = vmatpush.msrb.mxu1 %v1790_v30  ;;  %v155_v4 = vadd.f32 %v154_v22, %v2731_v12 }
 0x106   :  { %766 = vmatpush.msrb.mxu2 %v1527_v25  ;;  %786 = vmatpush.msra.mxu3 %v1785_v29 }
 0x107   :  { %691 = vmatpush.msrb.mxu1 %v1806_v35 }
 0x108   :  { %767 = vmatpush.msrb.mxu2 %v1539_v28  ;;  %787 = vmatpush.msra.mxu3 %v1801_v33 }
 0x109   :  { %692 = vmatpush.msrb.mxu1 %v1827_v43 }
 0x10a   :  { %768 = vmatpush.msrb.mxu2 %v1551_v31  ;;  %788 = vmatpush.msra.mxu3 %v1822_v39 }
 0x10b   :  { %693 = vmatpush.msrb.mxu1 %v1844_v50 }
 0x10c   :  { %769 = vmatpush.msrb.mxu2 %v2717_v3  ;;  %789 = vmatpush.msra.mxu3 %v2718_v5  ;;  %v2157_v25 = vpop.f32.mrf.mxu1 }
 0x10d   :  { %694 = vmatpush.msrb.mxu1 %v2719_v7 }
 0x10e   :  { %770 = vmatpush.msrb.mxu2 %v2720_v9  ;;  %790 = vmatpush.msra.mxu3 %v2721_v11 }
 0x10f   :  { %695 = vmatpush.msrb.mxu1 %v2722_v13 }
 0x110   :  { %771 = vmatpush.msrb.mxu2 %v2723_v15  ;;  %791 = vmatpush.msra.mxu3 %v2724_v19 }
 0x114   :  { %v2159_v28 = vpop.f32.mrf.mxu1 }
 0x11c   :  { %v2161_v31 = vpop.f32.mrf.mxu1 }
 0x11d   :  { %2725 = vst [vmem:[#allocation4_spill] sm:$0xff] %v2161_v31 }
 0x124   :  { %v2163_v47 = vpop.f32.mrf.mxu1 }
 0x125   :  { %2726 = vst [vmem:[#allocation7_spill] sm:$0xff] %v2163_v47 }
 0x12c   :  { %v2165_v36 = vpop.f32.mrf.mxu1 }
 0x12d   :  { %2727 = vst [vmem:[#allocation9_spill] sm:$0xff] %v2165_v36 }
 0x134   :  { %v2167_v51 = vpop.f32.mrf.mxu1 }
 0x135   :  { %2728 = vst [vmem:[#allocation5_spill] sm:$0xff] %v2167_v51 }
 0x16d   :  { %v425_v18 = vpop.f32.mrf.mxu1 }
 0x16e   :  { %v474_v59 = vadd.f32 %v425_v18, %v2730_v55 }
 0x170   :  { %v1234_v58 = vmul.f32 -1.442695, %v474_v59 }
 0x172   :  { %1266 = vpow2.f32 %v1234_v58 }
 0x173   :  { %v445_v23 = vpop.f32.mrf.mxu2 }
 0x174   :  { %v494_v63 = vadd.f32 %v445_v23, %v155_v4  ;;  %v465_v22 = vpop.f32.mrf.mxu3 }
 0x176   :  { %v1235_v6 = vmul.f32 -1.442695, %v494_v63 }
 0x178   :  { %v1267_v46 = vpop.eup %1266  ;;  %1268 = vpow2.f32 %v1235_v6  ;;  %v514_v6 = vadd.f32 %v2083_v14, %v465_v22 }
 0x179   :  { %v478_v27 = vadd.f32 1.0, %v1267_v46 }
 0x17b   :  { %1270 = vrcp.f32 %v478_v27  ;;  %v490_v15 = vand.u32 2147483648, %v478_v27  ;;  %v488_v18 = vand.u32 2147483647, %v478_v27  ;;  %vm484_vm9 = vweird.f32 %v478_v27 }
 0x17d   :  { %v491_v4 = vor.u32 1.1754944e-38, %v490_v15  ;;  %vm489_vm11 = vcmp.eq.f32.partialorder %v488_v18, 8.507059e+37 }
 0x17e   :  { %v1269_v40 = vpop.eup %1268 }
 0x17f   :  { %v498_v34 = vadd.f32 1.0, %v1269_v40 }
 0x181   :  { %v1271_v1 = vpop.eup %1270  ;;  %1272 = vrcp.f32 %v498_v34  ;;  %vm504_vm13 = vweird.f32 %v498_v34 }
 0x182   :  { %v480_v3 = vmul.f32 %v1271_v1, %v478_v27  ;;  %vm485_vm8 = vweird.f32 %v1271_v1 }
 0x183   :  { %vm486_vm10 = vmor %vm484_vm9, %vm485_vm8 }
 0x184   :  { %v481_v9 = vsub.f32 1.0, %v480_v3  ;;  %v510_v3 = vand.u32 2147483648, %v498_v34 }
 0x186   :  { %v482_v54 = vmul.f32 %v1271_v1, %v481_v9  ;;  %v508_v9 = vand.u32 2147483647, %v498_v34 }
 0x187   :  { %v1273_v55 = vpop.eup %1272 }
 0x188   :  { %v500_v59 = vmul.f32 %v1273_v55, %v498_v34  ;;  %v483_v58 = vadd.f32 %v1271_v1, %v482_v54  ;;  %vm505_vm12 = vweird.f32 %v1273_v55  ;;  %v511_v54 = vor.u32 1.1754944e-38, %v510_v3 }
 0x189   :  { %vm506_vm14 = vmor %vm504_vm13, %vm505_vm12  ;;  %vm509_vm15 = vcmp.eq.f32.partialorder %v508_v9, 8.507059e+37 }
 0x18a   :  { %v501_v23 = vsub.f32 1.0, %v500_v59  ;;  %v487_v63 = vsel %vm486_vm10, %v1271_v1, %v483_v58 }
 0x18b   :  { %v492_v46 = vsel %vm489_vm11, %v491_v4, %v487_v63 }
 0x18c   :  { %v502_v40 = vmul.f32 %v1273_v55, %v501_v23  ;;  %v515_v41 = vmul.f32 %v514_v6, %v492_v46 }
 0x18e   :  { %v503_v51 = vadd.f32 %v1273_v55, %v502_v40  ;;  %v516_v36 = vadd.f32 %v515_v41, %v2732_v42  ;;  %v2189_v41 = vld [vmem:[%s2662_s3 + $0x168] sm:$0xff] }
 0x190   :  { %v507_v27 = vsel %vm506_vm14, %v1273_v55, %v503_v51  ;;  %1274 = vtanh.f32 %v516_v36 }
 0x191   :  { %v512_v15 = vsel %vm509_vm15, %v511_v54, %v507_v27  ;;  %v2737_v54 = vld [vmem:[#allocation22_spill] sm:$0xff] }
 0x192   :  { %v518_v1 = vsub.f32 1.0, %v512_v15  ;;  %v520_v22 = vmul.f32 %v512_v15, %v2094_v62  ;;  %v2197_v62 = vld [vmem:[%s2662_s3 + $0x150] sm:$0xff] }
 0x196   :  { %v1275_v18 = vpop.eup %1274 }
 0x197   :  { %v519_v59 = vmul.f32 %v1275_v18, %v518_v1 }
 0x199   :  { %v2176_v58 = vadd.f32 %v520_v22, %v519_v59 }
 0x19b   :  { %1236 = vst [vmem:[%s2667_s6 + $0x8] sm:$0xff] %v2176_v58  ;;  %540 = vmatmul.f32.vlgmr.msra.gmra.mxu0 %v2176_v58  ;;  %560 = vmatmul.f32.vlgmr.msra.gmra.mxu1 %v2176_v58 }
 0x19c   :  { %580 = vmatmul.f32.vlgmr.msra.gmra.mxu2 %v2176_v58  ;;  %796 = vmatpush.msra.mxu0 %v1611_v45  ;;  %v2205_v45 = vld [vmem:[%s2662_s3 + $0x138] sm:$0xff] }
 0x19d   :  { %872 = vmatpush.msra.mxu1 %v2189_v41  ;;  %892 = vmatpush.msra.mxu2 %v1606_v44  ;;  %v2213_v44 = vld [vmem:[%s2662_s3 + $0x120] sm:$0xff] }
 0x19e   :  { %797 = vmatpush.msra.mxu0 %v1630_v49  ;;  %v2229_v49 = vld [vmem:[%s2662_s3 + $0xf0] sm:$0xff] }
 0x19f   :  { %873 = vmatpush.msra.mxu1 %v2197_v62  ;;  %893 = vmatpush.msra.mxu2 %v1625_v48  ;;  %v2221_v48 = vld [vmem:[%s2662_s3 + $0x108] sm:$0xff] }
 0x1a0   :  { %798 = vmatpush.msra.mxu0 %v1648_v53  ;;  %v2245_v53 = vld [vmem:[%s2662_s3 + $0xc0] sm:$0xff] }
 0x1a1   :  { %874 = vmatpush.msra.mxu1 %v2205_v45  ;;  %894 = vmatpush.msra.mxu2 %v1643_v52  ;;  %v2237_v52 = vld [vmem:[%s2662_s3 + $0xd8] sm:$0xff] }
 0x1a2   :  { %799 = vmatpush.msra.mxu0 %v1666_v57  ;;  %v2261_v57 = vld [vmem:[%s2662_s3 + $0x90] sm:$0xff] }
 0x1a3   :  { %875 = vmatpush.msra.mxu1 %v2213_v44  ;;  %895 = vmatpush.msra.mxu2 %v1661_v56  ;;  %v2253_v56 = vld [vmem:[%s2662_s3 + $0xa8] sm:$0xff] }
 0x1a4   :  { %800 = vmatpush.msra.mxu0 %v1686_v61  ;;  %v2277_v61 = vld [vmem:[%s2662_s3 + $0x60] sm:$0xff] }
 0x1a5   :  { %876 = vmatpush.msra.mxu1 %v2221_v48  ;;  %896 = vmatpush.msra.mxu2 %v1681_v60  ;;  %v2269_v60 = vld [vmem:[%s2662_s3 + $0x78] sm:$0xff] }
 0x1a6   :  { %801 = vmatpush.msra.mxu0 %v1705_v2  ;;  %v2293_v2 = vld [vmem:[%s2662_s3 + $0x30] sm:$0xff] }
 0x1a7   :  { %877 = vmatpush.msra.mxu1 %v2229_v49  ;;  %897 = vmatpush.msra.mxu2 %v1700_v0  ;;  %v2285_v0 = vld [vmem:[%s2662_s3 + $0x48] sm:$0xff]  ;;  %2733 = vst [vmem:[#allocation11_spill] sm:$0xff] %v2293_v2 }
 0x1a8   :  { %802 = vmatpush.msra.mxu0 %v1723_v10  ;;  %v2309_v10 = vld [vmem:[%s2662_s3] sm:$0xff] }
 0x1a9   :  { %878 = vmatpush.msra.mxu1 %v2237_v52  ;;  %898 = vmatpush.msra.mxu2 %v1718_v8  ;;  %v2301_v8 = vld [vmem:[%s2662_s3 + $0x18] sm:$0xff]  ;;  %2735 = vst [vmem:[#allocation10_spill] sm:$0xff] %v2309_v10 }
 0x1aa   :  { %803 = vmatpush.msra.mxu0 %v1741_v17  ;;  %2734 = vst [vmem:[#allocation6_spill] sm:$0xff] %v2301_v8 }
 0x1ab   :  { %879 = vmatpush.msra.mxu1 %v2245_v53  ;;  %899 = vmatpush.msra.mxu2 %v1736_v16  ;;  %v158_v16 = vadd.f32 %v2157_v25, %v2731_v12 }
 0x1ac   :  { %804 = vmatpush.msra.mxu0 %v1758_v21  ;;  %v2736_v21 = vld [vmem:[#allocation13_spill] sm:$0xff] }
 0x1ad   :  { %880 = vmatpush.msra.mxu1 %v2253_v56  ;;  %900 = vmatpush.msra.mxu2 %v1753_v20 }
 0x1ae   :  { %805 = vmatpush.msra.mxu0 %v1775_v26 }
 0x1af   :  { %881 = vmatpush.msra.mxu1 %v2261_v57  ;;  %901 = vmatpush.msra.mxu2 %v1769_v24 }
 0x1b0   :  { %806 = vmatpush.msra.mxu0 %v1790_v30 }
 0x1b1   :  { %882 = vmatpush.msra.mxu1 %v2269_v60  ;;  %902 = vmatpush.msra.mxu2 %v1785_v29 }
 0x1b2   :  { %807 = vmatpush.msra.mxu0 %v1806_v35 }
 0x1b3   :  { %883 = vmatpush.msra.mxu1 %v2277_v61  ;;  %903 = vmatpush.msra.mxu2 %v1801_v33 }
 0x1b4   :  { %808 = vmatpush.msra.mxu0 %v1827_v43 }
 0x1b5   :  { %884 = vmatpush.msra.mxu1 %v2285_v0  ;;  %904 = vmatpush.msra.mxu2 %v1822_v39 }
 0x1b6   :  { %809 = vmatpush.msra.mxu0 %v1844_v50 }
 0x1b7   :  { %885 = vmatpush.msra.mxu1 %v2293_v2  ;;  %905 = vmatpush.msra.mxu2 %v2718_v5 }
 0x1b8   :  { %810 = vmatpush.msra.mxu0 %v2719_v7 }
 0x1b9   :  { %886 = vmatpush.msra.mxu1 %v2301_v8  ;;  %906 = vmatpush.msra.mxu2 %v2721_v11 }
 0x1ba   :  { %811 = vmatpush.msra.mxu0 %v2722_v13 }
 0x1bb   :  { %887 = vmatpush.msra.mxu1 %v2309_v10  ;;  %907 = vmatpush.msra.mxu2 %v2724_v19 }
 0x218   :  { %v541_v17 = vpop.f32.mrf.mxu0  ;;  %v561_v20 = vpop.f32.mrf.mxu1 }
 0x219   :  { %v590_v24 = vadd.f32 %v541_v17, %v2736_v21  ;;  %v610_v26 = vadd.f32 %v561_v20, %v158_v16  ;;  %v2331_v21 = vld [vmem:[%s2662_s3 + $0x178] sm:$0xff] }
 0x21b   :  { %v1237_v29 = vmul.f32 -1.442695, %v590_v24  ;;  %v1238_v30 = vmul.f32 -1.442695, %v610_v26  ;;  %v2344_v24 = vld [vmem:[%s2662_s3 + $0x160] sm:$0xff]  ;;  %v2351_v26 = vld [vmem:[%s2662_s3 + $0x158] sm:$0xff] }
 0x21d   :  { %1276 = vpow2.f32 %v1237_v29  ;;  %v2357_v29 = vld [vmem:[%s2662_s3 + $0x148] sm:$0xff] }
 0x21e   :  { %1278 = vpow2.f32 %v1238_v30  ;;  %v2364_v30 = vld [vmem:[%s2662_s3 + $0x140] sm:$0xff] }
 0x21f   :  { %v581_v34 = vpop.f32.mrf.mxu2 }
 0x220   :  { %v630_v63 = vadd.f32 %v2083_v14, %v581_v34  ;;  %v2461_v34 = vld [vmem:[%s2662_s3 + $0x88] sm:$0xff] }
 0x223   :  { %v1277_v33 = vpop.eup %1276 }
 0x224   :  { %v1279_v35 = vpop.eup %1278  ;;  %v594_v39 = vadd.f32 1.0, %v1277_v33  ;;  %v2370_v33 = vld [vmem:[%s2662_s3 + $0x130] sm:$0xff] }
 0x225   :  { %v614_v43 = vadd.f32 1.0, %v1279_v35  ;;  %v2377_v35 = vld [vmem:[%s2662_s3 + $0x128] sm:$0xff] }
 0x226   :  { %1280 = vrcp.f32 %v594_v39  ;;  %v606_v19 = vand.u32 2147483648, %v594_v39  ;;  %v604_v36 = vand.u32 2147483647, %v594_v39  ;;  %vm600_vm1 = vweird.f32 %v594_v39 }
 0x227   :  { %1282 = vrcp.f32 %v614_v43  ;;  %v626_v40 = vand.u32 2147483648, %v614_v43  ;;  %vm620_vm5 = vweird.f32 %v614_v43  ;;  %v624_v9 = vand.u32 2147483647, %v614_v43 }
 0x228   :  { %v607_v4 = vor.u32 1.1754944e-38, %v606_v19  ;;  %vm605_vm3 = vcmp.eq.f32.partialorder %v604_v36, 8.507059e+37  ;;  %v2435_v19 = vld [vmem:[%s2662_s3 + $0xb8] sm:$0xff]  ;;  %v2448_v36 = vld [vmem:[%s2662_s3 + $0xa0] sm:$0xff] }
 0x229   :  { %v627_v1 = vor.u32 1.1754944e-38, %v626_v40  ;;  %vm625_vm7 = vcmp.eq.f32.partialorder %v624_v9, 8.507059e+37  ;;  %v2507_v40 = vld [vmem:[%s2662_s3 + $0x38] sm:$0xff]  ;;  %v2520_v9 = vld [vmem:[%s2662_s3 + $0x20] sm:$0xff] }
 0x22a   :  { %2738 = vst [vmem:[#allocation12_spill] sm:$0xff] %v2507_v40 }
 0x22b   :  { %2740 = vst [vmem:[#allocation13_spill] sm:$0xff] %v2520_v9 }
 0x22c   :  { %v1281_v50 = vpop.eup %1280 }
 0x22d   :  { %v1283_v42 = vpop.eup %1282  ;;  %v596_v5 = vmul.f32 %v1281_v50, %v594_v39  ;;  %vm601_vm0 = vweird.f32 %v1281_v50  ;;  %v2383_v39 = vld [vmem:[%s2662_s3 + $0x118] sm:$0xff] }
 0x22e   :  { %v616_v7 = vmul.f32 %v1283_v42, %v614_v43  ;;  %vm602_vm2 = vmor %vm600_vm1, %vm601_vm0  ;;  %vm621_vm4 = vweird.f32 %v1283_v42  ;;  %v2390_v43 = vld [vmem:[%s2662_s3 + $0x110] sm:$0xff] }
 0x22f   :  { %v597_v11 = vsub.f32 1.0, %v596_v5  ;;  %vm622_vm6 = vmor %vm620_vm5, %vm621_vm4  ;;  %v2409_v5 = vld [vmem:[%s2662_s3 + $0xe8] sm:$0xff] }
 0x230   :  { %v617_v13 = vsub.f32 1.0, %v616_v7  ;;  %v2416_v7 = vld [vmem:[%s2662_s3 + $0xe0] sm:$0xff] }
 0x231   :  { %v598_v25 = vmul.f32 %v1281_v50, %v597_v11  ;;  %v2422_v11 = vld [vmem:[%s2662_s3 + $0xd0] sm:$0xff] }
 0x232   :  { %v618_v51 = vmul.f32 %v1283_v42, %v617_v13  ;;  %v2429_v13 = vld [vmem:[%s2662_s3 + $0xc8] sm:$0xff] }
 0x233   :  { %v599_v55 = vadd.f32 %v1281_v50, %v598_v25  ;;  %v2442_v25 = vld [vmem:[%s2662_s3 + $0xb0] sm:$0xff] }
 0x234   :  { %v619_v6 = vadd.f32 %v1283_v42, %v618_v51  ;;  %v2455_v51 = vld [vmem:[%s2662_s3 + $0x98] sm:$0xff] }
 0x235   :  { %v603_v23 = vsel %vm602_vm2, %v1281_v50, %v599_v55  ;;  %v2396_v50 = vld [vmem:[%s2662_s3 + $0x100] sm:$0xff] }
 0x236   :  { %v608_v46 = vsel %vm605_vm3, %v607_v4, %v603_v23  ;;  %v623_v15 = vsel %vm622_vm6, %v1283_v42, %v619_v6  ;;  %v2403_v42 = vld [vmem:[%s2662_s3 + $0xf8] sm:$0xff]  ;;  %v2468_v55 = vld [vmem:[%s2662_s3 + $0x80] sm:$0xff]  ;;  %v2474_v4 = vld [vmem:[%s2662_s3 + $0x70] sm:$0xff] }
 0x237   :  { %v631_v3 = vmul.f32 %v630_v63, %v608_v46  ;;  %v628_v18 = vsel %vm625_vm7, %v627_v1, %v623_v15  ;;  %v2481_v23 = vld [vmem:[%s2662_s3 + $0x68] sm:$0xff]  ;;  %v2487_v63 = vld [vmem:[%s2662_s3 + $0x58] sm:$0xff]  ;;  %v2494_v6 = vld [vmem:[%s2662_s3 + $0x50] sm:$0xff]  ;;  %v161_v15 = vadd.f32 %v2159_v28, %v2731_v12 }
 0x238   :  { %v634_v59 = vsub.f32 1.0, %v628_v18  ;;  %v636_v17 = vmul.f32 %v628_v18, %v2176_v58  ;;  %v2338_v58 = vld [vmem:[%s2662_s3 + $0x170] sm:$0xff]  ;;  %v2500_v46 = vld [vmem:[%s2662_s3 + $0x40] sm:$0xff] }
 0x239   :  { %v632_v27 = vadd.f32 %v631_v3, %v2737_v54  ;;  %v2513_v3 = vld [vmem:[%s2662_s3 + $0x28] sm:$0xff]  ;;  %v2526_v54 = vld [vmem:[%s2662_s3 + $0x10] sm:$0xff] }
 0x23a   :  { %2739 = vst [vmem:[#allocation20_spill] sm:$0xff] %v2513_v3 }
 0x23b   :  { %1284 = vtanh.f32 %v632_v27  ;;  %2741 = vst [vmem:[#allocation22_spill] sm:$0xff] %v2526_v54  ;;  %v2533_v27 = vld [vmem:[%s2662_s3 + $0x8] sm:$0xff] }
 0x23c   :  { %2742 = vst [vmem:[#allocation26_spill] sm:$0xff] %v2533_v27 }
 0x241   :  { %v1285_v22 = vpop.eup %1284 }
 0x242   :  { %v635_v16 = vmul.f32 %v1285_v22, %v634_v59 }
 0x244   :  { %v2319_v20 = vadd.f32 %v636_v17, %v635_v16  ;;  %v2743_v16 = vld [vmem:[#allocation14_spill] sm:$0xff] }
 0x246   :  { %1239 = vst [vmem:[%s2667_s6 + $0x10] sm:$0xff] %v2319_v20  ;;  %656 = vmatmul.f32.vlgmr.msrb.gmra.mxu3 %v2319_v20  ;;  %676 = vmatmul.f32.vlgmr.msrb.gmra.mxu0 %v2319_v20 }
 0x247   :  { %696 = vmatmul.f32.vlgmr.msrb.gmra.mxu1 %v2319_v20  ;;  %912 = vmatpush.msrb.mxu3 %v2331_v21 }
 0x248   :  { %988 = vmatpush.msrb.mxu0 %v2189_v41  ;;  %1008 = vmatpush.msrb.mxu1 %v2338_v58 }
 0x249   :  { %913 = vmatpush.msrb.mxu3 %v2344_v24 }
 0x24a   :  { %989 = vmatpush.msrb.mxu0 %v2197_v62  ;;  %1009 = vmatpush.msrb.mxu1 %v2351_v26 }
 0x24b   :  { %914 = vmatpush.msrb.mxu3 %v2357_v29 }
 0x24c   :  { %990 = vmatpush.msrb.mxu0 %v2205_v45  ;;  %1010 = vmatpush.msrb.mxu1 %v2364_v30 }
 0x24d   :  { %915 = vmatpush.msrb.mxu3 %v2370_v33 }
 0x24e   :  { %991 = vmatpush.msrb.mxu0 %v2213_v44  ;;  %1011 = vmatpush.msrb.mxu1 %v2377_v35 }
 0x24f   :  { %916 = vmatpush.msrb.mxu3 %v2383_v39 }
 0x250   :  { %992 = vmatpush.msrb.mxu0 %v2221_v48  ;;  %1012 = vmatpush.msrb.mxu1 %v2390_v43 }
 0x251   :  { %917 = vmatpush.msrb.mxu3 %v2396_v50 }
 0x252   :  { %993 = vmatpush.msrb.mxu0 %v2229_v49  ;;  %1013 = vmatpush.msrb.mxu1 %v2403_v42 }
 0x253   :  { %918 = vmatpush.msrb.mxu3 %v2409_v5 }
 0x254   :  { %994 = vmatpush.msrb.mxu0 %v2237_v52  ;;  %1014 = vmatpush.msrb.mxu1 %v2416_v7 }
 0x255   :  { %919 = vmatpush.msrb.mxu3 %v2422_v11 }
 0x256   :  { %995 = vmatpush.msrb.mxu0 %v2245_v53  ;;  %1015 = vmatpush.msrb.mxu1 %v2429_v13 }
 0x257   :  { %920 = vmatpush.msrb.mxu3 %v2435_v19 }
 0x258   :  { %996 = vmatpush.msrb.mxu0 %v2253_v56  ;;  %1016 = vmatpush.msrb.mxu1 %v2442_v25 }
 0x259   :  { %921 = vmatpush.msrb.mxu3 %v2448_v36 }
 0x25a   :  { %997 = vmatpush.msrb.mxu0 %v2261_v57  ;;  %1017 = vmatpush.msrb.mxu1 %v2455_v51 }
 0x25b   :  { %922 = vmatpush.msrb.mxu3 %v2461_v34 }
 0x25c   :  { %998 = vmatpush.msrb.mxu0 %v2269_v60  ;;  %1018 = vmatpush.msrb.mxu1 %v2468_v55 }
 0x25d   :  { %923 = vmatpush.msrb.mxu3 %v2474_v4 }
 0x25e   :  { %999 = vmatpush.msrb.mxu0 %v2277_v61  ;;  %1019 = vmatpush.msrb.mxu1 %v2481_v23 }
 0x25f   :  { %924 = vmatpush.msrb.mxu3 %v2487_v63 }
 0x260   :  { %1000 = vmatpush.msrb.mxu0 %v2285_v0  ;;  %1020 = vmatpush.msrb.mxu1 %v2494_v6 }
 0x261   :  { %925 = vmatpush.msrb.mxu3 %v2500_v46 }
 0x262   :  { %1001 = vmatpush.msrb.mxu0 %v2293_v2  ;;  %1021 = vmatpush.msrb.mxu1 %v2507_v40 }
 0x263   :  { %926 = vmatpush.msrb.mxu3 %v2513_v3 }
 0x264   :  { %1002 = vmatpush.msrb.mxu0 %v2301_v8  ;;  %1022 = vmatpush.msrb.mxu1 %v2520_v9 }
 0x265   :  { %927 = vmatpush.msrb.mxu3 %v2526_v54 }
 0x266   :  { %1003 = vmatpush.msrb.mxu0 %v2309_v10  ;;  %1023 = vmatpush.msrb.mxu1 %v2533_v27 }
 0x2c3   :  { %v677_v1 = vpop.f32.mrf.mxu0 }
 0x2c4   :  { %v726_v18 = vadd.f32 %v677_v1, %v161_v15 }
 0x2c6   :  { %v1241_v59 = vmul.f32 -1.442695, %v726_v18 }
 0x2c8   :  { %1286 = vpow2.f32 %v1241_v59 }
 0x2c9   :  { %v657_v22 = vpop.f32.mrf.mxu3 }
 0x2ca   :  { %v706_v17 = vadd.f32 %v657_v22, %v2743_v16  ;;  %v697_v22 = vpop.f32.mrf.mxu1 }
 0x2cc   :  { %v1240_v37 = vmul.f32 -1.442695, %v706_v17 }
 0x2ce   :  { %v1287_v47 = vpop.eup %1286  ;;  %1288 = vpow2.f32 %v1240_v37 }
 0x2cf   :  { %v730_v38 = vadd.f32 1.0, %v1287_v47  ;;  %v746_v47 = vadd.f32 %v2083_v14, %v697_v22 }
 0x2d1   :  { %1290 = vrcp.f32 %v730_v38  ;;  %v742_v40 = vand.u32 2147483648, %v730_v38  ;;  %vm736_vm13 = vweird.f32 %v730_v38 }
 0x2d3   :  { %v743_v2 = vor.u32 1.1754944e-38, %v742_v40 }
 0x2d4   :  { %v1289_v31 = vpop.eup %1288 }
 0x2d5   :  { %v710_v10 = vadd.f32 1.0, %v1289_v31 }
 0x2d7   :  { %1292 = vrcp.f32 %v710_v10  ;;  %v1291_v54 = vpop.eup %1290  ;;  %v722_v15 = vand.u32 2147483648, %v710_v10  ;;  %v720_v18 = vand.u32 2147483647, %v710_v10  ;;  %vm716_vm9 = vweird.f32 %v710_v10 }
 0x2d8   :  { %v732_v27 = vmul.f32 %v1291_v54, %v730_v38  ;;  %vm737_vm12 = vweird.f32 %v1291_v54 }
 0x2d9   :  { %v723_v37 = vor.u32 1.1754944e-38, %v722_v15  ;;  %vm721_vm11 = vcmp.eq.f32.partialorder %v720_v18, 8.507059e+37  ;;  %vm738_vm14 = vmor %vm736_vm13, %vm737_vm12 }
 0x2da   :  { %v733_v28 = vsub.f32 1.0, %v732_v27 }
 0x2dc   :  { %v734_v59 = vmul.f32 %v1291_v54, %v733_v28 }
 0x2dd   :  { %v1293_v9 = vpop.eup %1292 }
 0x2de   :  { %v712_v8 = vmul.f32 %v1293_v9, %v710_v10  ;;  %vm717_vm8 = vweird.f32 %v1293_v9  ;;  %v735_v17 = vadd.f32 %v1291_v54, %v734_v59 }
 0x2df   :  { %vm718_vm10 = vmor %vm716_vm9, %vm717_vm8 }
 0x2e0   :  { %v713_v12 = vsub.f32 1.0, %v712_v8  ;;  %v740_v8 = vand.u32 2147483647, %v730_v38  ;;  %v739_v28 = vsel %vm738_vm14, %v1291_v54, %v735_v17  ;;  %v2745_v38 = vld [vmem:[#allocation12_spill] sm:$0xff] }
 0x2e2   :  { %v714_v1 = vmul.f32 %v1293_v9, %v713_v12  ;;  %vm741_vm15 = vcmp.eq.f32.partialorder %v740_v8, 8.507059e+37 }
 0x2e3   :  { %v744_v10 = vsel %vm741_vm15, %v743_v2, %v739_v28  ;;  %v2755_v28 = vld [vmem:[#allocation23_spill] sm:$0xff] }
 0x2e4   :  { %v715_v16 = vadd.f32 %v1293_v9, %v714_v1  ;;  %v750_v15 = vsub.f32 1.0, %v744_v10 }
 0x2e6   :  { %v719_v31 = vsel %vm718_vm10, %v1293_v9, %v715_v16  ;;  %v752_v9 = vmul.f32 %v744_v10, %v2319_v20 }
 0x2e7   :  { %v724_v3 = vsel %vm721_vm11, %v723_v37, %v719_v31 }
 0x2e8   :  { %v747_v27 = vmul.f32 %v746_v47, %v724_v3 }
 0x2ea   :  { %v748_v12 = vadd.f32 %v747_v27, %v2088_v32  ;;  %v2744_v32 = vld [vmem:[#allocation11_spill] sm:$0xff] }
 0x2ec   :  { %1294 = vtanh.f32 %v748_v12 }
 0x2f2   :  { %v1295_v1 = vpop.eup %1294 }
 0x2f3   :  { %v751_v22 = vmul.f32 %v1295_v1, %v750_v15 }
 0x2f5   :  { %v2542_v18 = vadd.f32 %v752_v9, %v751_v22 }
 0x2f7   :  { %1242 = vst [vmem:[%s2667_s6 + $0x18] sm:$0xff] %v2542_v18  ;;  %772 = vmatmul.f32.vlgmr.msrb.gmra.mxu2 %v2542_v18  ;;  %792 = vmatmul.f32.vlgmr.msra.gmra.mxu3 %v2542_v18 }
 0x2f8   :  { %812 = vmatmul.f32.vlgmr.msra.gmra.mxu0 %v2542_v18  ;;  %1028 = vmatpush.msrb.mxu2 %v2331_v21 }
 0x2f9   :  { %1104 = vmatpush.msra.mxu3 %v2189_v41  ;;  %1124 = vmatpush.msra.mxu0 %v2338_v58  ;;  %v2746_v41 = vld [vmem:[#allocation20_spill] sm:$0xff] }
 0x2fa   :  { %1029 = vmatpush.msrb.mxu2 %v2344_v24 }
 0x2fb   :  { %1105 = vmatpush.msra.mxu3 %v2197_v62  ;;  %1125 = vmatpush.msra.mxu0 %v2351_v26  ;;  %v2747_v62 = vld [vmem:[#allocation6_spill] sm:$0xff] }
 0x2fc   :  { %1030 = vmatpush.msrb.mxu2 %v2357_v29 }
 0x2fd   :  { %1106 = vmatpush.msra.mxu3 %v2205_v45  ;;  %1126 = vmatpush.msra.mxu0 %v2364_v30  ;;  %v2748_v45 = vld [vmem:[#allocation13_spill] sm:$0xff] }
 0x2fe   :  { %1031 = vmatpush.msrb.mxu2 %v2370_v33 }
 0x2ff   :  { %1107 = vmatpush.msra.mxu3 %v2213_v44  ;;  %1127 = vmatpush.msra.mxu0 %v2377_v35  ;;  %v2749_v44 = vld [vmem:[#allocation22_spill] sm:$0xff] }
 0x300   :  { %1032 = vmatpush.msrb.mxu2 %v2383_v39 }
 0x301   :  { %1108 = vmatpush.msra.mxu3 %v2221_v48  ;;  %1128 = vmatpush.msra.mxu0 %v2390_v43  ;;  %v2750_v48 = vld [vmem:[#allocation10_spill] sm:$0xff] }
 0x302   :  { %1033 = vmatpush.msrb.mxu2 %v2396_v50 }
 0x303   :  { %1109 = vmatpush.msra.mxu3 %v2229_v49  ;;  %1129 = vmatpush.msra.mxu0 %v2403_v42  ;;  %v2751_v49 = vld [vmem:[#allocation26_spill] sm:$0xff] }
 0x304   :  { %1034 = vmatpush.msrb.mxu2 %v2409_v5 }
 0x305   :  { %1110 = vmatpush.msra.mxu3 %v2237_v52  ;;  %1130 = vmatpush.msra.mxu0 %v2416_v7  ;;  %v2752_v52 = vld [vmem:[#allocation15_spill] sm:$0xff] }
 0x306   :  { %1035 = vmatpush.msrb.mxu2 %v2422_v11 }
 0x307   :  { %1111 = vmatpush.msra.mxu3 %v2245_v53  ;;  %1131 = vmatpush.msra.mxu0 %v2429_v13  ;;  %v2753_v53 = vld [vmem:[#allocation4_spill] sm:$0xff] }
 0x308   :  { %1036 = vmatpush.msrb.mxu2 %v2435_v19 }
 0x309   :  { %1112 = vmatpush.msra.mxu3 %v2253_v56  ;;  %1132 = vmatpush.msra.mxu0 %v2442_v25  ;;  %v164_v56 = vadd.f32 %v2753_v53, %v2752_v52 }
 0x30a   :  { %1037 = vmatpush.msrb.mxu2 %v2448_v36 }
 0x30b   :  { %1113 = vmatpush.msra.mxu3 %v2261_v57  ;;  %1133 = vmatpush.msra.mxu0 %v2455_v51 }
 0x30c   :  { %1038 = vmatpush.msrb.mxu2 %v2461_v34 }
 0x30d   :  { %1114 = vmatpush.msra.mxu3 %v2269_v60  ;;  %1134 = vmatpush.msra.mxu0 %v2468_v55 }
 0x30e   :  { %1039 = vmatpush.msrb.mxu2 %v2474_v4 }
 0x30f   :  { %1115 = vmatpush.msra.mxu3 %v2277_v61  ;;  %1135 = vmatpush.msra.mxu0 %v2481_v23  ;;  %v2754_v61 = vld [vmem:[#allocation16_spill] sm:$0xff] }
 0x310   :  { %1040 = vmatpush.msrb.mxu2 %v2487_v63 }
 0x311   :  { %1116 = vmatpush.msra.mxu3 %v2285_v0  ;;  %1136 = vmatpush.msra.mxu0 %v2494_v6 }
 0x312   :  { %1041 = vmatpush.msrb.mxu2 %v2500_v46 }
 0x313   :  { %1117 = vmatpush.msra.mxu3 %v2744_v32  ;;  %1137 = vmatpush.msra.mxu0 %v2745_v38 }
 0x314   :  { %1042 = vmatpush.msrb.mxu2 %v2746_v41 }
 0x315   :  { %1118 = vmatpush.msra.mxu3 %v2747_v62  ;;  %1138 = vmatpush.msra.mxu0 %v2748_v45 }
 0x316   :  { %1043 = vmatpush.msrb.mxu2 %v2749_v44 }
 0x317   :  { %1119 = vmatpush.msra.mxu3 %v2750_v48  ;;  %1139 = vmatpush.msra.mxu0 %v2751_v49 }
 0x375   :  { %v813_v3 = vpop.f32.mrf.mxu0 }
 0x376   :  { %v862_v37 = vadd.f32 %v2083_v14, %v813_v3 }
 0x37a   :  { %v773_v57 = vpop.f32.mrf.mxu2  ;;  %v793_v60 = vpop.f32.mrf.mxu3 }
 0x37b   :  { %v822_v0 = vadd.f32 %v773_v57, %v2754_v61  ;;  %v842_v2 = vadd.f32 %v793_v60, %v164_v56 }
 0x37d   :  { %v1243_v20 = vmul.f32 -1.442695, %v822_v0  ;;  %v1244_v58 = vmul.f32 -1.442695, %v842_v2  ;;  %v2636_v2 = vld [vmem:[%s2665_s4] ss:$0 sm:$0xff] }
 0x37f   :  { %1296 = vpow2.f32 %v1243_v20 }
 0x380   :  { %1298 = vpow2.f32 %v1244_v58 }
 0x385   :  { %v1297_v26 = vpop.eup %1296 }
 0x386   :  { %v1299_v30 = vpop.eup %1298  ;;  %v826_v35 = vadd.f32 1.0, %v1297_v26 }
 0x387   :  { %v846_v43 = vadd.f32 1.0, %v1299_v30 }
 0x388   :  { %1300 = vrcp.f32 %v826_v35  ;;  %v838_v55 = vand.u32 2147483648, %v826_v35  ;;  %v836_v40 = vand.u32 2147483647, %v826_v35  ;;  %vm832_vm1 = vweird.f32 %v826_v35 }
 0x389   :  { %1302 = vrcp.f32 %v846_v43  ;;  %v858_v8 = vand.u32 2147483648, %v846_v43  ;;  %vm852_vm5 = vweird.f32 %v846_v43  ;;  %v856_v12 = vand.u32 2147483647, %v846_v43 }
 0x38a   :  { %v839_v16 = vor.u32 1.1754944e-38, %v838_v55  ;;  %vm837_vm3 = vcmp.eq.f32.partialorder %v836_v40, 8.507059e+37 }
 0x38b   :  { %v859_v1 = vor.u32 1.1754944e-38, %v858_v8  ;;  %vm857_vm7 = vcmp.eq.f32.partialorder %v856_v12, 8.507059e+37 }
 0x38e   :  { %v1301_v42 = vpop.eup %1300 }
 0x38f   :  { %v1303_v7 = vpop.eup %1302  ;;  %v828_v13 = vmul.f32 %v1301_v42, %v826_v35  ;;  %vm833_vm0 = vweird.f32 %v1301_v42 }
 0x390   :  { %v848_v25 = vmul.f32 %v1303_v7, %v846_v43  ;;  %vm834_vm2 = vmor %vm832_vm1, %vm833_vm0  ;;  %vm853_vm4 = vweird.f32 %v1303_v7 }
 0x391   :  { %v829_v51 = vsub.f32 1.0, %v828_v13  ;;  %vm854_vm6 = vmor %vm852_vm5, %vm853_vm4 }
 0x392   :  { %v849_v23 = vsub.f32 1.0, %v848_v25 }
 0x393   :  { %v830_v6 = vmul.f32 %v1301_v42, %v829_v51 }
 0x394   :  { %v850_v54 = vmul.f32 %v1303_v7, %v849_v23 }
 0x395   :  { %v831_v59 = vadd.f32 %v1301_v42, %v830_v6 }
 0x396   :  { %v851_v17 = vadd.f32 %v1303_v7, %v850_v54 }
 0x397   :  { %v835_v47 = vsel %vm834_vm2, %v1301_v42, %v831_v59  ;;  %v2759_v59 = vld [vmem:[#allocation9_spill] sm:$0xff] }
 0x398   :  { %v840_v31 = vsel %vm837_vm3, %v839_v16, %v835_v47  ;;  %v855_v15 = vsel %vm854_vm6, %v1303_v7, %v851_v17  ;;  %v2758_v7 = vld [vmem:[#allocation24_spill] sm:$0xff]  ;;  %v170_v16 = vadd.f32 %v2759_v59, %v2752_v52 }
 0x399   :  { %v863_v27 = vmul.f32 %v862_v37, %v840_v31  ;;  %v860_v22 = vsel %vm857_vm7, %v859_v1, %v855_v15  ;;  %v2760_v31 = vld [vmem:[#allocation18_spill] sm:$0xff] }
 0x39a   :  { %v866_v9 = vsub.f32 1.0, %v860_v22  ;;  %v868_v38 = vmul.f32 %v860_v22, %v2542_v18 }
 0x39b   :  { %v864_v10 = vadd.f32 %v863_v27, %v2755_v28 }
 0x39d   :  { %1304 = vtanh.f32 %v864_v10 }
 0x3a3   :  { %v1305_v32 = vpop.eup %1304 }
 0x3a4   :  { %v867_v14 = vmul.f32 %v1305_v32, %v866_v9 }
 0x3a6   :  { %v2605_v62 = vadd.f32 %v868_v38, %v867_v14 }
 0x3a8   :  { %1245 = vst [vmem:[%s2667_s6 + $0x20] sm:$0xff] %v2605_v62  ;;  %888 = vmatmul.f32.vlgmr.msra.gmra.mxu1 %v2605_v62  ;;  %908 = vmatmul.f32.vlgmr.msra.gmra.mxu2 %v2605_v62 }
 0x3a9   :  { %928 = vmatmul.f32.vlgmr.msrb.gmra.mxu3 %v2605_v62  ;;  %1144 = vmatpush.msra.mxu1 %v2331_v21 }
 0x3ab   :  { %1145 = vmatpush.msra.mxu1 %v2344_v24  ;;  %v2756_v24 = vld [vmem:[#allocation17_spill] sm:$0xff] }
 0x3ad   :  { %1146 = vmatpush.msra.mxu1 %v2357_v29 }
 0x3af   :  { %1147 = vmatpush.msra.mxu1 %v2370_v33 }
 0x3b1   :  { %1148 = vmatpush.msra.mxu1 %v2383_v39  ;;  %v2757_v39 = vld [vmem:[#allocation7_spill] sm:$0xff] }
 0x3b3   :  { %1149 = vmatpush.msra.mxu1 %v2396_v50  ;;  %v167_v50 = vadd.f32 %v2757_v39, %v2752_v52 }
 0x3b5   :  { %1150 = vmatpush.msra.mxu1 %v2409_v5 }
 0x3b7   :  { %1151 = vmatpush.msra.mxu1 %v2422_v11 }
 0x3b9   :  { %1152 = vmatpush.msra.mxu1 %v2435_v19 }
 0x3bb   :  { %1153 = vmatpush.msra.mxu1 %v2448_v36 }
 0x3bd   :  { %1154 = vmatpush.msra.mxu1 %v2461_v34 }
 0x3bf   :  { %1155 = vmatpush.msra.mxu1 %v2474_v4 }
 0x3c1   :  { %1156 = vmatpush.msra.mxu1 %v2487_v63 }
 0x3c3   :  { %1157 = vmatpush.msra.mxu1 %v2500_v46 }
 0x3c5   :  { %1158 = vmatpush.msra.mxu1 %v2746_v41 }
 0x3c7   :  { %1159 = vmatpush.msra.mxu1 %v2749_v44 }
 0x425   :  { %v889_v21 = vpop.f32.mrf.mxu1 }
 0x426   :  { %v938_v29 = vadd.f32 %v889_v21, %v2756_v24 }
 0x428   :  { %v1246_v33 = vmul.f32 -1.442695, %v938_v29 }
 0x42a   :  { %1306 = vpow2.f32 %v1246_v33 }
 0x42b   :  { %v909_v5 = vpop.f32.mrf.mxu2 }
 0x42c   :  { %v958_v11 = vadd.f32 %v909_v5, %v167_v50  ;;  %v929_v53 = vpop.f32.mrf.mxu3 }
 0x42d   :  { %v978_v20 = vadd.f32 %v2636_v2, %v929_v53 }
 0x42e   :  { %v1247_v19 = vmul.f32 -1.442695, %v958_v11 }
 0x430   :  { %v1307_v36 = vpop.eup %1306  ;;  %1308 = vpow2.f32 %v1247_v19 }
 0x431   :  { %v942_v34 = vadd.f32 1.0, %v1307_v36 }
 0x433   :  { %1310 = vrcp.f32 %v942_v34  ;;  %v954_v45 = vand.u32 2147483648, %v942_v34  ;;  %v952_v48 = vand.u32 2147483647, %v942_v34  ;;  %vm948_vm9 = vweird.f32 %v942_v34 }
 0x435   :  { %v955_v60 = vor.u32 1.1754944e-38, %v954_v45  ;;  %vm953_vm11 = vcmp.eq.f32.partialorder %v952_v48, 8.507059e+37 }
 0x436   :  { %v1309_v4 = vpop.eup %1308 }
 0x437   :  { %v962_v63 = vadd.f32 1.0, %v1309_v4 }
 0x439   :  { %v1311_v46 = vpop.eup %1310  ;;  %1312 = vrcp.f32 %v962_v63  ;;  %v974_v30 = vand.u32 2147483648, %v962_v63  ;;  %v972_v43 = vand.u32 2147483647, %v962_v63  ;;  %vm968_vm13 = vweird.f32 %v962_v63 }
 0x43a   :  { %v944_v18 = vmul.f32 %v1311_v46, %v942_v34  ;;  %vm949_vm8 = vweird.f32 %v1311_v46 }
 0x43b   :  { %vm950_vm10 = vmor %vm948_vm9, %vm949_vm8  ;;  %v975_v25 = vor.u32 1.1754944e-38, %v974_v30  ;;  %vm973_vm15 = vcmp.eq.f32.partialorder %v972_v43, 8.507059e+37 }
 0x43c   :  { %v945_v41 = vsub.f32 1.0, %v944_v18  ;;  %v2761_v18 = vld [vmem:[#allocation25_spill] sm:$0xff] }
 0x43e   :  { %v946_v44 = vmul.f32 %v1311_v46, %v945_v41 }
 0x43f   :  { %v1313_v49 = vpop.eup %1312 }
 0x440   :  { %v964_v56 = vmul.f32 %v1313_v49, %v962_v63  ;;  %v947_v57 = vadd.f32 %v1311_v46, %v946_v44  ;;  %vm969_vm12 = vweird.f32 %v1313_v49 }
 0x441   :  { %vm970_vm14 = vmor %vm968_vm13, %vm969_vm12 }
 0x442   :  { %v965_v61 = vsub.f32 1.0, %v964_v56  ;;  %v951_v0 = vsel %vm950_vm10, %v1311_v46, %v947_v57 }
 0x443   :  { %v956_v58 = vsel %vm953_vm11, %v955_v60, %v951_v0 }
 0x444   :  { %v966_v26 = vmul.f32 %v1313_v49, %v965_v61  ;;  %v979_v35 = vmul.f32 %v978_v20, %v956_v58  ;;  %v2762_v61 = vld [vmem:[#allocation5_spill] sm:$0xff] }
 0x445   :  { %v173_v0 = vadd.f32 %v2762_v61, %v2752_v52 }
 0x446   :  { %v967_v42 = vadd.f32 %v1313_v49, %v966_v26  ;;  %v980_v13 = vadd.f32 %v979_v35, %v2758_v7  ;;  %v2763_v35 = vld [vmem:[#allocation21_spill] sm:$0xff] }
 0x448   :  { %v971_v51 = vsel %vm970_vm14, %v1313_v49, %v967_v42  ;;  %1314 = vtanh.f32 %v980_v13 }
 0x449   :  { %v976_v55 = vsel %vm973_vm15, %v975_v25, %v971_v51 }
 0x44a   :  { %v982_v23 = vsub.f32 1.0, %v976_v55  ;;  %v984_v3 = vmul.f32 %v976_v55, %v2605_v62 }
 0x44e   :  { %v1315_v6 = vpop.eup %1314 }
 0x44f   :  { %v983_v40 = vmul.f32 %v1315_v6, %v982_v23 }
 0x451   :  { %v985_v54 = vadd.f32 %v984_v3, %v983_v40 }
 0x453   :  { %1248 = vst [vmem:[%s2667_s6 + $0x28] sm:$0xff] %v985_v54  ;;  %1004 = vmatmul.f32.vlgmr.msrb.gmra.mxu0 %v985_v54  ;;  %1024 = vmatmul.f32.vlgmr.msrb.gmra.mxu1 %v985_v54 }
 0x454   :  { %1044 = vmatmul.f32.vlgmr.msrb.gmra.mxu2 %v985_v54 }
 0x4d0   :  { %v1005_v37 = vpop.f32.mrf.mxu0  ;;  %v1025_v47 = vpop.f32.mrf.mxu1 }
 0x4d1   :  { %v1054_v17 = vadd.f32 %v1005_v37, %v2760_v31  ;;  %v1074_v27 = vadd.f32 %v1025_v47, %v170_v16 }
 0x4d3   :  { %v1249_v8 = vmul.f32 -1.442695, %v1054_v17  ;;  %v1250_v12 = vmul.f32 -1.442695, %v1074_v27 }
 0x4d5   :  { %1316 = vpow2.f32 %v1249_v8 }
 0x4d6   :  { %1318 = vpow2.f32 %v1250_v12 }
 0x4d7   :  { %v1045_v39 = vpop.f32.mrf.mxu2 }
 0x4d8   :  { %v1094_v19 = vadd.f32 %v2636_v2, %v1045_v39 }
 0x4db   :  { %v1317_v28 = vpop.eup %1316 }
 0x4dc   :  { %v1319_v10 = vpop.eup %1318  ;;  %v1058_v15 = vadd.f32 1.0, %v1317_v28 }
 0x4dd   :  { %v1078_v1 = vadd.f32 1.0, %v1319_v10  ;;  %v2764_v10 = vld [vmem:[#allocation19_spill] sm:$0xff] }
 0x4de   :  { %1320 = vrcp.f32 %v1058_v15  ;;  %v1070_v21 = vand.u32 2147483648, %v1058_v15  ;;  %v1068_v29 = vand.u32 2147483647, %v1058_v15  ;;  %vm1064_vm1 = vweird.f32 %v1058_v15 }
 0x4df   :  { %1322 = vrcp.f32 %v1078_v1  ;;  %v1090_v4 = vand.u32 2147483648, %v1078_v1  ;;  %vm1084_vm5 = vweird.f32 %v1078_v1  ;;  %v1088_v46 = vand.u32 2147483647, %v1078_v1 }
 0x4e0   :  { %v1071_v5 = vor.u32 1.1754944e-38, %v1070_v21  ;;  %vm1069_vm3 = vcmp.eq.f32.partialorder %v1068_v29, 8.507059e+37 }
 0x4e1   :  { %v1091_v44 = vor.u32 1.1754944e-38, %v1090_v4  ;;  %vm1089_vm7 = vcmp.eq.f32.partialorder %v1088_v46, 8.507059e+37 }
 0x4e4   :  { %v1321_v22 = vpop.eup %1320 }
 0x4e5   :  { %v1323_v9 = vpop.eup %1322  ;;  %v1060_v32 = vmul.f32 %v1321_v22, %v1058_v15  ;;  %vm1065_vm0 = vweird.f32 %v1321_v22  ;;  %v2765_v15 = vld [vmem:[#allocation8_spill] sm:$0xff] }
 0x4e6   :  { %v1080_v14 = vmul.f32 %v1323_v9, %v1078_v1  ;;  %vm1066_vm2 = vmor %vm1064_vm1, %vm1065_vm0  ;;  %vm1085_vm4 = vweird.f32 %v1323_v9  ;;  %v214_v1 = vadd.f32 %v2765_v15, %v2764_v10 }
 0x4e7   :  { %v1061_v38 = vsub.f32 1.0, %v1060_v32  ;;  %vm1086_vm6 = vmor %vm1084_vm5, %vm1085_vm4 }
 0x4e8   :  { %v1081_v62 = vsub.f32 1.0, %v1080_v14 }
 0x4e9   :  { %v1062_v24 = vmul.f32 %v1321_v22, %v1061_v38 }
 0x4ea   :  { %v1082_v33 = vmul.f32 %v1323_v9, %v1081_v62 }
 0x4eb   :  { %v1063_v50 = vadd.f32 %v1321_v22, %v1062_v24 }
 0x4ec   :  { %v1083_v36 = vadd.f32 %v1323_v9, %v1082_v33 }
 0x4ed   :  { %v1067_v11 = vsel %vm1066_vm2, %v1321_v22, %v1063_v50 }
 0x4ee   :  { %v1072_v34 = vsel %vm1069_vm3, %v1071_v5, %v1067_v11  ;;  %v1087_v45 = vsel %vm1086_vm6, %v1323_v9, %v1083_v36 }
 0x4ef   :  { %v1095_v63 = vmul.f32 %v1094_v19, %v1072_v34  ;;  %v1092_v48 = vsel %vm1089_vm7, %v1091_v44, %v1087_v45 }
 0x4f0   :  { %v1098_v49 = vsub.f32 1.0, %v1092_v48  ;;  %v1100_v57 = vmul.f32 %v1092_v48, %v985_v54 }
 0x4f1   :  { %v1096_v41 = vadd.f32 %v1095_v63, %v2761_v18 }
 0x4f3   :  { %1324 = vtanh.f32 %v1096_v41 }
 0x4f9   :  { %v1325_v53 = vpop.eup %1324 }
 0x4fa   :  { %v1099_v56 = vmul.f32 %v1325_v53, %v1098_v49 }
 0x4fc   :  { %v1101_v60 = vadd.f32 %v1100_v57, %v1099_v56 }
 0x4fe   :  { %1251 = vst [vmem:[%s2667_s6 + $0x30] sm:$0xff] %v1101_v60  ;;  %1120 = vmatmul.f32.vlgmr.msra.gmra.mxu3 %v1101_v60  ;;  %1140 = vmatmul.f32.vlgmr.msra.gmra.mxu0 %v1101_v60 }
 0x4ff   :  { %1160 = vmatmul.f32.vlgmr.msra.gmra.mxu1 %v1101_v60 }
 0x57b   :  { %v1141_v20 = vpop.f32.mrf.mxu0 }
 0x57c   :  { %v1190_v58 = vadd.f32 %v1141_v20, %v173_v0  ;;  %v1161_v47 = vpop.f32.mrf.mxu1 }
 0x57d   :  { %v1210_v27 = vadd.f32 %v2636_v2, %v1161_v47 }
 0x57e   :  { %v1253_v26 = vmul.f32 -1.442695, %v1190_v58 }
 0x580   :  { %1326 = vpow2.f32 %v1253_v26 }
 0x581   :  { %v1121_v30 = vpop.f32.mrf.mxu3 }
 0x582   :  { %v1170_v43 = vadd.f32 %v1121_v30, %v2763_v35 }
 0x584   :  { %v1252_v42 = vmul.f32 -1.442695, %v1170_v43 }
 0x586   :  { %v1327_v7 = vpop.eup %1326  ;;  %1328 = vpow2.f32 %v1252_v42 }
 0x587   :  { %v1194_v13 = vadd.f32 1.0, %v1327_v7 }
 0x589   :  { %1330 = vrcp.f32 %v1194_v13  ;;  %v1206_v22 = vand.u32 2147483648, %v1194_v13  ;;  %vm1200_vm13 = vweird.f32 %v1194_v13  ;;  %v1204_v32 = vand.u32 2147483647, %v1194_v13 }
 0x58b   :  { %v1207_v62 = vor.u32 1.1754944e-38, %v1206_v22  ;;  %vm1205_vm15 = vcmp.eq.f32.partialorder %v1204_v32, 8.507059e+37 }
 0x58c   :  { %v1329_v25 = vpop.eup %1328 }
 0x58d   :  { %v1174_v51 = vadd.f32 1.0, %v1329_v25 }
 0x58f   :  { %1332 = vrcp.f32 %v1174_v51  ;;  %v1331_v55 = vpop.eup %1330  ;;  %v1186_v54 = vand.u32 2147483648, %v1174_v51  ;;  %v1184_v16 = vand.u32 2147483647, %v1174_v51  ;;  %vm1180_vm9 = vweird.f32 %v1174_v51 }
 0x590   :  { %v1196_v23 = vmul.f32 %v1331_v55, %v1194_v13  ;;  %vm1201_vm12 = vweird.f32 %v1331_v55 }
 0x591   :  { %v1187_v17 = vor.u32 1.1754944e-38, %v1186_v54  ;;  %vm1185_vm11 = vcmp.eq.f32.partialorder %v1184_v16, 8.507059e+37  ;;  %vm1202_vm14 = vmor %vm1200_vm13, %vm1201_vm12 }
 0x592   :  { %v1197_v52 = vsub.f32 1.0, %v1196_v23 }
 0x594   :  { %v1198_v37 = vmul.f32 %v1331_v55, %v1197_v52 }
 0x595   :  { %v1333_v6 = vpop.eup %1332 }
 0x596   :  { %v1176_v40 = vmul.f32 %v1333_v6, %v1174_v51  ;;  %vm1181_vm8 = vweird.f32 %v1333_v6  ;;  %v1199_v12 = vadd.f32 %v1331_v55, %v1198_v37 }
 0x597   :  { %vm1182_vm10 = vmor %vm1180_vm9, %vm1181_vm8 }
 0x598   :  { %v1177_v3 = vsub.f32 1.0, %v1176_v40  ;;  %v1203_v38 = vsel %vm1202_vm14, %v1331_v55, %v1199_v12 }
 0x599   :  { %v1208_v21 = vsel %vm1205_vm15, %v1207_v62, %v1203_v38 }
 0x59a   :  { %v1178_v59 = vmul.f32 %v1333_v6, %v1177_v3  ;;  %v1214_v2 = vsub.f32 1.0, %v1208_v21  ;;  %v1216_v29 = vmul.f32 %v1208_v21, %v1101_v60 }
 0x59c   :  { %v1179_v31 = vadd.f32 %v1333_v6, %v1178_v59 }
 0x59e   :  { %v1183_v8 = vsel %vm1182_vm10, %v1333_v6, %v1179_v31 }
 0x59f   :  { %v1188_v28 = vsel %vm1185_vm11, %v1187_v17, %v1183_v8 }
 0x5a0   :  { %v1211_v9 = vmul.f32 %v1210_v27, %v1188_v28 }
 0x5a2   :  { %v1212_v14 = vadd.f32 %v1211_v9, %v214_v1 }
 0x5a4   :  { %1334 = vtanh.f32 %v1212_v14 }
 0x5aa   :  { %v1335_v24 = vpop.eup %1334 }
 0x5ab   :  { %v1215_v33 = vmul.f32 %v1335_v24, %v1214_v2 }
 0x5ad   :  { %v1217_v39 = vadd.f32 %v1216_v29, %v1215_v33 }
 0x5af   :  { %1254 = vst [vmem:[%s2667_s6 + $0x38] sm:$0xff] %v1217_v39 }

</bundles_post_ra>
